<compile_context>
chip_gen: v7x
topology: tpu7x:2x2x1
jax: 0.10.0
libtpu: 0.0.40
codegen_flags: <defaults>
</compile_context>

<pallas_src>
import functools

import jax
import jax.numpy as jnp
from jax import lax
from jax.experimental import pallas as pl
from jax.experimental.pallas import tpu as pltpu


# ----------------------------------------------------------------------------
# expm1 support probe (zero-cost accuracy win from the review; safe fallback)
# ----------------------------------------------------------------------------
_EXPM1_SUPPORTED = None


def _expm1_supported():
    """Probe (once) whether jnp.expm1 lowers inside a Pallas TPU kernel."""
    global _EXPM1_SUPPORTED
    if _EXPM1_SUPPORTED is None:
        def probe_kernel(x_ref, o_ref):
            o_ref[...] = jnp.expm1(x_ref[...])

        try:
            jax.block_until_ready(
                pl.pallas_call(
                    probe_kernel,
                    out_shape=jax.ShapeDtypeStruct((8, 128), jnp.float32),
                )(jnp.zeros((8, 128), jnp.float32)))
            _EXPM1_SUPPORTED = True
        except Exception:
            _EXPM1_SUPPORTED = False
    return _EXPM1_SUPPORTED


# ----------------------------------------------------------------------------
# Kernel
# ----------------------------------------------------------------------------
def _residual_block_kernel(x_ref, w1_ref, w2_ref, o_ref,
                           xpad_ref, midpad_ref, *, use_expm1=True):
    # x_ref     : (H, W, C)            cdt  full input image (also the residual)
    # w1_ref    : (KH*KW, C, C)        cdt  conv1 tap matrices (kh, kw, in, out)
    # w2_ref    : (KH*KW, C, C)        cdt  conv2 tap matrices
    # o_ref     : (T, W, C)            f32  output strip (T rows of H)
    # xpad_ref  : (H + 4ph, W + 2pw,C) cdt  persistent scratch: 2*ph/pw padded x
    # midpad_ref: (T + 2ph, W + 2pw,C) cdt  scratch: side-padded ELU(conv1) strip
    H, W, C = x_ref.shape
    T, _, _ = o_ref.shape
    Tm = midpad_ref.shape[0]
    Wp = midpad_ref.shape[1]
    ph = (Tm - T) // 2
    pw = (Wp - W) // 2
    KH = 2 * ph + 1
    KW = 2 * pw + 1
    cdt = xpad_ref.dtype

    def elu(v):
        neg = jnp.minimum(v, 0.0)
        if use_expm1:
            return jnp.where(v > 0.0, v, jnp.expm1(neg))
        return jnp.where(v > 0.0, v, jnp.exp(neg) - 1.0)

    s = pl.program_id(1)                   # strip index along H
    row0 = s * T                           # first output row of this strip
    if T % 8 == 0:
        row0 = pl.multiple_of(row0, 8)

    # ---- build the (2*ph)-halo zero-padded input once per image -------------
    # (single full-width store composed in registers; no thin masked halo vst)
    @pl.when(s == 0)
    def _():
        xi = x_ref[...]                                        # (H, W, C) cdt
        if pw > 0:
            zc = jnp.zeros((H, pw, C), cdt)
            xi = jnp.concatenate([zc, xi, zc], axis=1)
        if ph > 0:
            zr = jnp.zeros((2 * ph, Wp, C), cdt)
            xi = jnp.concatenate([zr, xi, zr], axis=0)
        xpad_ref[...] = xi

    # ---- conv1 on the strip + ph halo rows: KH*KW accumulating window dots --
    # window loads and MXU dots interleave (no im2col staging buffer).
    acc1 = jnp.zeros((Tm * W, C), jnp.float32)
    for kh in range(KH):
        for kw in range(KW):
            win = xpad_ref[pl.ds(row0 + kh, Tm), pl.ds(kw, W), :]
            acc1 = acc1 + jnp.dot(win.reshape(Tm * W, C),
                                  w1_ref[kh * KW + kw],
                                  preferred_element_type=jnp.float32)

    # ELU, zero the halo rows that fall outside the image (they are conv2's
    # "same" padding), and store the side-padded mid strip in one full store.
    mid = elu(acc1).reshape(Tm, W, C)
    if ph > 0:
        ridx = lax.broadcasted_iota(jnp.int32, (Tm, W, C), 0) + (row0 - ph)
        mid = jnp.where((ridx >= 0) & (ridx < H), mid, 0.0)
    mid = mid.astype(cdt)
    if pw > 0:
        zc = jnp.zeros((Tm, pw, C), cdt)
        mid = jnp.concatenate([zc, mid, zc], axis=1)
    midpad_ref[...] = mid

    # ---- conv2 on the strip: accumulating window dots ------------------------
    acc2 = jnp.zeros((T * W, C), jnp.float32)
    for kh in range(KH):
        for kw in range(KW):
            win = midpad_ref[pl.ds(kh, T), pl.ds(kw, W), :]
            acc2 = acc2 + jnp.dot(win.reshape(T * W, C),
                                  w2_ref[kh * KW + kw],
                                  preferred_element_type=jnp.float32)

    # ---- residual add + ELU in f32 -------------------------------------------
    xr = x_ref[pl.ds(row0, T), :, :].astype(jnp.float32).reshape(T * W, C)
    o_ref[...] = elu(acc2 + xr).reshape(T, W, C).astype(o_ref.dtype)


# ----------------------------------------------------------------------------
# Wrapper
# ----------------------------------------------------------------------------
def residual_block_forward(x_nchw, w1_oihw, w2_oihw, *,
                           compute_dtype=jnp.bfloat16, tile_h=None):
    """x_nchw: (N, C, H, W) f32; weights in PyTorch OIHW layout (C, C, KH, KW)."""
    N, C, H, W = x_nchw.shape
    Cout, Cin, KH, KW = (int(d) for d in w1_oihw.shape)
    assert Cout == C and Cin == C, "residual block expects Cin == Cout"
    assert KH % 2 == 1 and KW % 2 == 1, "odd kernel size expected ('same' pad)"
    ph, pw = (KH - 1) // 2, (KW - 1) // 2
    Wp = W + 2 * pw
    Hp2 = H + 4 * ph

    cdt = jnp.dtype(compute_dtype)
    csize = cdt.itemsize

    # Inputs in NHWC, DMA'd in the compute dtype (bf16 fast path halves input
    # HBM bytes; the residual add upcasts to f32 in-kernel, output stays f32).
    x = jnp.transpose(x_nchw, (0, 2, 3, 1)).astype(compute_dtype)
    # OIHW -> (KH*KW, Cin, Cout): one (C, C) tap matrix per (kh, kw).
    w1 = jnp.transpose(w1_oihw, (2, 3, 1, 0)).reshape(KH * KW, C, C).astype(compute_dtype)
    w2 = jnp.transpose(w2_oihw, (2, 3, 1, 0)).reshape(KH * KW, C, C).astype(compute_dtype)

    # ---- VMEM budgeting from the real allocations (per-generation cap) ------
    try:
        info = pltpu.get_tpu_info()
        phys = int(getattr(info, "vmem_capacity_bytes", 0)) or (64 << 20)
    except Exception:
        phys = 64 << 20                      # conservative (v7x-sized) fallback
    cap = int(phys * 0.78)                   # ~100 MiB on 128 MiB chips, ~50 MiB on v7x

    fixed = (2 * H * W * C * csize           # full-image x block (double buffered)
             + 4 * KH * KW * C * C * csize   # both weight stacks (double buffered)
             + Hp2 * Wp * C * csize)         # padded-input scratch (persistent)

    def step_bytes(t):
        tm = t + 2 * ph
        return (2 * t * W * C * 4            # output strip block (double buffered)
                + tm * Wp * C * csize        # padded mid scratch
                + 6 * tm * W * C * 4)        # live f32 accumulators / temps (slack)

    if tile_h is None:
        divisors = sorted({d for d in range(1, H + 1) if H % d == 0}, reverse=True)
        target = max(8, -(-H // 4))          # prefer >=4 strips but keep >=8 rows
        tile_h = next((d for d in divisors
                       if d <= target and fixed + step_bytes(d) <= cap),
                      divisors[-1])
    assert H % tile_h == 0, "tile_h must divide H"
    T = int(tile_h)
    S = H // T
    Tm = T + 2 * ph

    vmem_limit = int(min(cap, max(32 << 20, int(1.25 * (fixed + step_bytes(T))))))

    kernel = functools.partial(_residual_block_kernel,
                               use_expm1=_expm1_supported())

    out_nhwc = pl.pallas_call(
        kernel,
        out_shape=jax.ShapeDtypeStruct((N, H, W, C), jnp.float32),
        grid_spec=pltpu.PrefetchScalarGridSpec(
            num_scalar_prefetch=0,
            grid=(N, S),
            in_specs=[
                # full image, constant block index across strips -> one DMA / n
                pl.BlockSpec((None, H, W, C), lambda n, s: (n, 0, 0, 0)),
                pl.BlockSpec((KH * KW, C, C), lambda n, s: (0, 0, 0)),
                pl.BlockSpec((KH * KW, C, C), lambda n, s: (0, 0, 0)),
            ],
            out_specs=pl.BlockSpec((None, T, W, C), lambda n, s: (n, s, 0, 0)),
            scratch_shapes=[
                pltpu.VMEM((Hp2, Wp, C), compute_dtype),   # padded input (per image)
                pltpu.VMEM((Tm, Wp, C), compute_dtype),    # padded ELU(conv1) strip
            ],
        ),
        compiler_params=pltpu.CompilerParams(
            # strip axis must stay serial (it reuses the padded-x scratch built
            # at s == 0); the batch axis is megacore-parallel.
            dimension_semantics=("parallel", "arbitrary"),
            vmem_limit_bytes=vmem_limit,
        ),
    )(x, w1, w2)

    return jnp.transpose(out_nhwc, (0, 3, 1, 2))    # back to NCHW


# ----------------------------------------------------------------------------
# Pure-JAX reference (mirrors the PyTorch forward, NCHW / OIHW)
# ----------------------------------------------------------------------------
def ref_forward(x_nchw, w1_oihw, w2_oihw):
    def elu(v):
        return jnp.where(v > 0, v, jnp.expm1(v))
    dn = lax.conv_dimension_numbers(x_nchw.shape, w1_oihw.shape,
                                    ('NCHW', 'OIHW', 'NCHW'))
    y = lax.conv_general_dilated(x_nchw, w1_oihw, (1, 1), 'SAME',
                                 dimension_numbers=dn)
    y = elu(y)
    y = lax.conv_general_dilated(y, w2_oihw, (1, 1), 'SAME',
                                 dimension_numbers=dn)
    return elu(y + x_nchw)


if __name__ == "__main__":
    key = jax.random.PRNGKey(0)
    k_x, k_w1, k_w2 = jax.random.split(key, 3)

    N, C, H, W = 2, 4, 16, 16      # in_planes = 4
    KH = KW = 3                    # kernel_size = 3

    x = jax.random.normal(k_x, (N, C, H, W), dtype=jnp.float32)
    # deterministic synthetic weights (PyTorch OIHW layout), no bias
    w1 = 0.1 * jax.random.normal(k_w1, (C, C, KH, KW), dtype=jnp.float32)
    w2 = 0.1 * jax.random.normal(k_w2, (C, C, KH, KW), dtype=jnp.float32)

    ref = ref_forward(x, w1, w2)

    # f32 MXU-feed path: tight check (also exercises both edge strips, S = 2).
    out_f32 = jax.block_until_ready(
        residual_block_forward(x, w1, w2, compute_dtype=jnp.float32))
    assert out_f32.shape == (N, C, H, W)
    err_f32 = float(jnp.max(jnp.abs(out_f32 - ref)))
    assert err_f32 < 5e-4, f"f32 path max abs err = {err_f32}"

    # bf16 MXU-feed path (v5e/v6e/v7x fast path), f32 accumulation + residual.
    out_bf16 = jax.block_until_ready(
        residual_block_forward(x, w1, w2, compute_dtype=jnp.bfloat16))
    err_bf16 = float(jnp.max(jnp.abs(out_bf16 - ref)))
    assert err_bf16 < 5e-2, f"bf16 path max abs err = {err_bf16}"

    print("KERNEL_OK")
</pallas_src>

<mosaic_0001>
module attributes {stable_mosaic.version = 11 : i64} {
  func.func @_residual_block_kernel(%arg0: i32, %arg1: i32, %arg2: memref<1x16x16x4xf32, #tpu.memory_space<vmem>>, %arg3: memref<9x4x4xf32, #tpu.memory_space<vmem>>, %arg4: memref<9x4x4xf32, #tpu.memory_space<vmem>>, %arg5: memref<1x8x16x4xf32, #tpu.memory_space<vmem>>, %arg6: memref<20x18x4xf32, #tpu.memory_space<vmem>>, %arg7: memref<10x18x4xf32, #tpu.memory_space<vmem>>) attributes {dimension_semantics = [#tpu.dimension_semantics<parallel>, #tpu.dimension_semantics<arbitrary>], iteration_bounds = array<i64: 2, 2>, scalar_prefetch = 0 : i64, scratch_operands = 2 : i64, tpu.core_type = #tpu.core_type<tc>, window_params = [{transform_indices = @transform_0, window_bounds = array<i64: 1, 16, 16, 4>}, {pipeline_mode = #tpu.pipeline_mode<synchronous>, transform_indices = @transform_1, window_bounds = array<i64: 9, 4, 4>}, {pipeline_mode = #tpu.pipeline_mode<synchronous>, transform_indices = @transform_2, window_bounds = array<i64: 9, 4, 4>}, {transform_indices = @transform_3, window_bounds = array<i64: 1, 8, 16, 4>}]} {
    %c8_i32 = arith.constant 8 : i32
    %0 = arith.muli %arg1, %c8_i32 : i32
    %1 = tpu.assume_multiple %0, 8 : i32
    %c0_i32 = arith.constant 0 : i32
    %2 = arith.cmpi eq, %arg1, %c0_i32 : i32
    %3 = arith.extui %2 : i1 to i32
    %c0_i32_0 = arith.constant 0 : i32
    %4 = arith.cmpi ne, %3, %c0_i32_0 : i32
    scf.if %4 {
      %c0_137 = arith.constant 0 : index
      %c0_138 = arith.constant 0 : index
      %c0_139 = arith.constant 0 : index
      %c0_140 = arith.constant 0 : index
      %173 = vector.load %arg2[%c0_137, %c0_138, %c0_139, %c0_140] : memref<1x16x16x4xf32, #tpu.memory_space<vmem>>, vector<1x16x16x4xf32>
      %174 = vector.shape_cast %173 : vector<1x16x16x4xf32> to vector<16x16x4xf32>
      %cst_141 = arith.constant 0.000000e+00 : f32
      %175 = vector.broadcast %cst_141 : f32 to vector<16x1x4xf32>
      %176 = tpu.concatenate %175, %174, %175 in 1 : vector<16x1x4xf32>, vector<16x16x4xf32>, vector<16x1x4xf32> -> vector<16x18x4xf32>
      %cst_142 = arith.constant 0.000000e+00 : f32
      %177 = vector.broadcast %cst_142 : f32 to vector<2x18x4xf32>
      %178 = tpu.concatenate %177, %176, %177 in 0 : vector<2x18x4xf32>, vector<16x18x4xf32>, vector<2x18x4xf32> -> vector<20x18x4xf32>
      %c0_143 = arith.constant 0 : index
      %c0_144 = arith.constant 0 : index
      %c0_145 = arith.constant 0 : index
      %179 = vector.load %arg6[%c0_143, %c0_144, %c0_145] : memref<20x18x4xf32, #tpu.memory_space<vmem>>, vector<20x18x4xf32>
      tpu.vector_store %arg6[%c0_143, %c0_144, %c0_145], %178 {strides = array<i32>} : memref<20x18x4xf32, #tpu.memory_space<vmem>>, vector<20x18x4xf32>,
    } else {
    }
    %cst = arith.constant 0.000000e+00 : f32
    %5 = vector.broadcast %cst : f32 to vector<160x4xf32>
    %c0_i32_1 = arith.constant 0 : i32
    %6 = arith.addi %1, %c0_i32_1 : i32
    %7 = arith.index_cast %6 : i32 to index
    %c0 = arith.constant 0 : index
    %c0_2 = arith.constant 0 : index
    %8 = vector.load %arg6[%7, %c0, %c0_2] : memref<20x18x4xf32, #tpu.memory_space<vmem>>, vector<10x16x4xf32>
    %9 = vector.shape_cast %8 : vector<10x16x4xf32> to vector<160x4xf32>
    %c0_3 = arith.constant 0 : index
    %c0_4 = arith.constant 0 : index
    %c0_5 = arith.constant 0 : index
    %10 = vector.load %arg3[%c0_3, %c0_4, %c0_5] : memref<9x4x4xf32, #tpu.memory_space<vmem>>, vector<1x4x4xf32>
    %11 = vector.shape_cast %10 : vector<1x4x4xf32> to vector<4x4xf32>
    %cst_6 = arith.constant dense<0.000000e+00> : vector<160x4xf32>
    %12 = tpu.matmul %9, %11, %cst_6 {dimension_numbers = #tpu.dot_dimension_numbers<[1], [0], [0], [1], [0, 0, 1, 1], [], []>} : vector<160x4xf32>, vector<4x4xf32>, vector<160x4xf32> -> vector<160x4xf32>
    %13 = arith.addf %5, %12 : vector<160x4xf32>
    %c0_i32_7 = arith.constant 0 : i32
    %14 = arith.addi %1, %c0_i32_7 : i32
    %15 = arith.index_cast %14 : i32 to index
    %c1 = arith.constant 1 : index
    %c0_8 = arith.constant 0 : index
    %16 = vector.load %arg6[%15, %c1, %c0_8] : memref<20x18x4xf32, #tpu.memory_space<vmem>>, vector<10x16x4xf32>
    %17 = vector.shape_cast %16 : vector<10x16x4xf32> to vector<160x4xf32>
    %c1_9 = arith.constant 1 : index
    %c0_10 = arith.constant 0 : index
    %c0_11 = arith.constant 0 : index
    %18 = vector.load %arg3[%c1_9, %c0_10, %c0_11] : memref<9x4x4xf32, #tpu.memory_space<vmem>>, vector<1x4x4xf32>
    %19 = vector.shape_cast %18 : vector<1x4x4xf32> to vector<4x4xf32>
    %cst_12 = arith.constant dense<0.000000e+00> : vector<160x4xf32>
    %20 = tpu.matmul %17, %19, %cst_12 {dimension_numbers = #tpu.dot_dimension_numbers<[1], [0], [0], [1], [0, 0, 1, 1], [], []>} : vector<160x4xf32>, vector<4x4xf32>, vector<160x4xf32> -> vector<160x4xf32>
    %21 = arith.addf %13, %20 : vector<160x4xf32>
    %c0_i32_13 = arith.constant 0 : i32
    %22 = arith.addi %1, %c0_i32_13 : i32
    %23 = arith.index_cast %22 : i32 to index
    %c2 = arith.constant 2 : index
    %c0_14 = arith.constant 0 : index
    %24 = vector.load %arg6[%23, %c2, %c0_14] : memref<20x18x4xf32, #tpu.memory_space<vmem>>, vector<10x16x4xf32>
    %25 = vector.shape_cast %24 : vector<10x16x4xf32> to vector<160x4xf32>
    %c2_15 = arith.constant 2 : index
    %c0_16 = arith.constant 0 : index
    %c0_17 = arith.constant 0 : index
    %26 = vector.load %arg3[%c2_15, %c0_16, %c0_17] : memref<9x4x4xf32, #tpu.memory_space<vmem>>, vector<1x4x4xf32>
    %27 = vector.shape_cast %26 : vector<1x4x4xf32> to vector<4x4xf32>
    %cst_18 = arith.constant dense<0.000000e+00> : vector<160x4xf32>
    %28 = tpu.matmul %25, %27, %cst_18 {dimension_numbers = #tpu.dot_dimension_numbers<[1], [0], [0], [1], [0, 0, 1, 1], [], []>} : vector<160x4xf32>, vector<4x4xf32>, vector<160x4xf32> -> vector<160x4xf32>
    %29 = arith.addf %21, %28 : vector<160x4xf32>
    %c1_i32 = arith.constant 1 : i32
    %30 = arith.addi %1, %c1_i32 : i32
    %31 = arith.index_cast %30 : i32 to index
    %c0_19 = arith.constant 0 : index
    %c0_20 = arith.constant 0 : index
    %32 = vector.load %arg6[%31, %c0_19, %c0_20] : memref<20x18x4xf32, #tpu.memory_space<vmem>>, vector<10x16x4xf32>
    %33 = vector.shape_cast %32 : vector<10x16x4xf32> to vector<160x4xf32>
    %c3 = arith.constant 3 : index
    %c0_21 = arith.constant 0 : index
    %c0_22 = arith.constant 0 : index
    %34 = vector.load %arg3[%c3, %c0_21, %c0_22] : memref<9x4x4xf32, #tpu.memory_space<vmem>>, vector<1x4x4xf32>
    %35 = vector.shape_cast %34 : vector<1x4x4xf32> to vector<4x4xf32>
    %cst_23 = arith.constant dense<0.000000e+00> : vector<160x4xf32>
    %36 = tpu.matmul %33, %35, %cst_23 {dimension_numbers = #tpu.dot_dimension_numbers<[1], [0], [0], [1], [0, 0, 1, 1], [], []>} : vector<160x4xf32>, vector<4x4xf32>, vector<160x4xf32> -> vector<160x4xf32>
    %37 = arith.addf %29, %36 : vector<160x4xf32>
    %c1_i32_24 = arith.constant 1 : i32
    %38 = arith.addi %1, %c1_i32_24 : i32
    %39 = arith.index_cast %38 : i32 to index
    %c1_25 = arith.constant 1 : index
    %c0_26 = arith.constant 0 : index
    %40 = vector.load %arg6[%39, %c1_25, %c0_26] : memref<20x18x4xf32, #tpu.memory_space<vmem>>, vector<10x16x4xf32>
    %41 = vector.shape_cast %40 : vector<10x16x4xf32> to vector<160x4xf32>
    %c4 = arith.constant 4 : index
    %c0_27 = arith.constant 0 : index
    %c0_28 = arith.constant 0 : index
    %42 = vector.load %arg3[%c4, %c0_27, %c0_28] : memref<9x4x4xf32, #tpu.memory_space<vmem>>, vector<1x4x4xf32>
    %43 = vector.shape_cast %42 : vector<1x4x4xf32> to vector<4x4xf32>
    %cst_29 = arith.constant dense<0.000000e+00> : vector<160x4xf32>
    %44 = tpu.matmul %41, %43, %cst_29 {dimension_numbers = #tpu.dot_dimension_numbers<[1], [0], [0], [1], [0, 0, 1, 1], [], []>} : vector<160x4xf32>, vector<4x4xf32>, vector<160x4xf32> -> vector<160x4xf32>
    %45 = arith.addf %37, %44 : vector<160x4xf32>
    %c1_i32_30 = arith.constant 1 : i32
    %46 = arith.addi %1, %c1_i32_30 : i32
    %47 = arith.index_cast %46 : i32 to index
    %c2_31 = arith.constant 2 : index
    %c0_32 = arith.constant 0 : index
    %48 = vector.load %arg6[%47, %c2_31, %c0_32] : memref<20x18x4xf32, #tpu.memory_space<vmem>>, vector<10x16x4xf32>
    %49 = vector.shape_cast %48 : vector<10x16x4xf32> to vector<160x4xf32>
    %c5 = arith.constant 5 : index
    %c0_33 = arith.constant 0 : index
    %c0_34 = arith.constant 0 : index
    %50 = vector.load %arg3[%c5, %c0_33, %c0_34] : memref<9x4x4xf32, #tpu.memory_space<vmem>>, vector<1x4x4xf32>
    %51 = vector.shape_cast %50 : vector<1x4x4xf32> to vector<4x4xf32>
    %cst_35 = arith.constant dense<0.000000e+00> : vector<160x4xf32>
    %52 = tpu.matmul %49, %51, %cst_35 {dimension_numbers = #tpu.dot_dimension_numbers<[1], [0], [0], [1], [0, 0, 1, 1], [], []>} : vector<160x4xf32>, vector<4x4xf32>, vector<160x4xf32> -> vector<160x4xf32>
    %53 = arith.addf %45, %52 : vector<160x4xf32>
    %c2_i32 = arith.constant 2 : i32
    %54 = arith.addi %1, %c2_i32 : i32
    %55 = arith.index_cast %54 : i32 to index
    %c0_36 = arith.constant 0 : index
    %c0_37 = arith.constant 0 : index
    %56 = vector.load %arg6[%55, %c0_36, %c0_37] : memref<20x18x4xf32, #tpu.memory_space<vmem>>, vector<10x16x4xf32>
    %57 = vector.shape_cast %56 : vector<10x16x4xf32> to vector<160x4xf32>
    %c6 = arith.constant 6 : index
    %c0_38 = arith.constant 0 : index
    %c0_39 = arith.constant 0 : index
    %58 = vector.load %arg3[%c6, %c0_38, %c0_39] : memref<9x4x4xf32, #tpu.memory_space<vmem>>, vector<1x4x4xf32>
    %59 = vector.shape_cast %58 : vector<1x4x4xf32> to vector<4x4xf32>
    %cst_40 = arith.constant dense<0.000000e+00> : vector<160x4xf32>
    %60 = tpu.matmul %57, %59, %cst_40 {dimension_numbers = #tpu.dot_dimension_numbers<[1], [0], [0], [1], [0, 0, 1, 1], [], []>} : vector<160x4xf32>, vector<4x4xf32>, vector<160x4xf32> -> vector<160x4xf32>
    %61 = arith.addf %53, %60 : vector<160x4xf32>
    %c2_i32_41 = arith.constant 2 : i32
    %62 = arith.addi %1, %c2_i32_41 : i32
    %63 = arith.index_cast %62 : i32 to index
    %c1_42 = arith.constant 1 : index
    %c0_43 = arith.constant 0 : index
    %64 = vector.load %arg6[%63, %c1_42, %c0_43] : memref<20x18x4xf32, #tpu.memory_space<vmem>>, vector<10x16x4xf32>
    %65 = vector.shape_cast %64 : vector<10x16x4xf32> to vector<160x4xf32>
    %c7 = arith.constant 7 : index
    %c0_44 = arith.constant 0 : index
    %c0_45 = arith.constant 0 : index
    %66 = vector.load %arg3[%c7, %c0_44, %c0_45] : memref<9x4x4xf32, #tpu.memory_space<vmem>>, vector<1x4x4xf32>
    %67 = vector.shape_cast %66 : vector<1x4x4xf32> to vector<4x4xf32>
    %cst_46 = arith.constant dense<0.000000e+00> : vector<160x4xf32>
    %68 = tpu.matmul %65, %67, %cst_46 {dimension_numbers = #tpu.dot_dimension_numbers<[1], [0], [0], [1], [0, 0, 1, 1], [], []>} : vector<160x4xf32>, vector<4x4xf32>, vector<160x4xf32> -> vector<160x4xf32>
    %69 = arith.addf %61, %68 : vector<160x4xf32>
    %c2_i32_47 = arith.constant 2 : i32
    %70 = arith.addi %1, %c2_i32_47 : i32
    %71 = arith.index_cast %70 : i32 to index
    %c2_48 = arith.constant 2 : index
    %c0_49 = arith.constant 0 : index
    %72 = vector.load %arg6[%71, %c2_48, %c0_49] : memref<20x18x4xf32, #tpu.memory_space<vmem>>, vector<10x16x4xf32>
    %73 = vector.shape_cast %72 : vector<10x16x4xf32> to vector<160x4xf32>
    %c8 = arith.constant 8 : index
    %c0_50 = arith.constant 0 : index
    %c0_51 = arith.constant 0 : index
    %74 = vector.load %arg3[%c8, %c0_50, %c0_51] : memref<9x4x4xf32, #tpu.memory_space<vmem>>, vector<1x4x4xf32>
    %75 = vector.shape_cast %74 : vector<1x4x4xf32> to vector<4x4xf32>
    %cst_52 = arith.constant dense<0.000000e+00> : vector<160x4xf32>
    %76 = tpu.matmul %73, %75, %cst_52 {dimension_numbers = #tpu.dot_dimension_numbers<[1], [0], [0], [1], [0, 0, 1, 1], [], []>} : vector<160x4xf32>, vector<4x4xf32>, vector<160x4xf32> -> vector<160x4xf32>
    %77 = arith.addf %69, %76 : vector<160x4xf32>
    %cst_53 = arith.constant 0.000000e+00 : f32
    %78 = vector.broadcast %cst_53 : f32 to vector<160x4xf32>
    %79 = arith.minimumf %77, %78 : vector<160x4xf32>
    %cst_54 = arith.constant 0.000000e+00 : f32
    %80 = vector.broadcast %cst_54 : f32 to vector<160x4xf32>
    %81 = arith.cmpf ogt, %77, %80 : vector<160x4xf32>
    %82 = math.exp %79 : vector<160x4xf32>
    %cst_55 = arith.constant 1.000000e+00 : f32
    %83 = vector.broadcast %cst_55 : f32 to vector<160x4xf32>
    %84 = arith.subf %82, %83 : vector<160x4xf32>
    %85 = arith.select %81, %77, %84 : vector<160x4xi1>, vector<160x4xf32>
    %86 = vector.shape_cast %85 : vector<160x4xf32> to vector<10x16x4xf32>
    %87 = tpu.iota {dimensions = array<i32: 0>} : vector<10x16x4xi32>
    %c1_i32_56 = arith.constant 1 : i32
    %88 = arith.subi %1, %c1_i32_56 : i32
    %89 = vector.broadcast %88 : i32 to vector<10x16x4xi32>
    %90 = arith.addi %87, %89 : vector<10x16x4xi32>
    %c0_i32_57 = arith.constant 0 : i32
    %91 = vector.broadcast %c0_i32_57 : i32 to vector<10x16x4xi32>
    %92 = arith.cmpi sge, %90, %91 : vector<10x16x4xi32>
    %c16_i32 = arith.constant 16 : i32
    %93 = vector.broadcast %c16_i32 : i32 to vector<10x16x4xi32>
    %94 = arith.cmpi slt, %90, %93 : vector<10x16x4xi32>
    %95 = arith.andi %92, %94 : vector<10x16x4xi1>
    %cst_58 = arith.constant 0.000000e+00 : f32
    %96 = vector.broadcast %cst_58 : f32 to vector<10x16x4xf32>
    %97 = arith.select %95, %86, %96 : vector<10x16x4xi1>, vector<10x16x4xf32>
    %cst_59 = arith.constant 0.000000e+00 : f32
    %98 = vector.broadcast %cst_59 : f32 to vector<10x1x4xf32>
    %99 = tpu.concatenate %98, %97, %98 in 1 : vector<10x1x4xf32>, vector<10x16x4xf32>, vector<10x1x4xf32> -> vector<10x18x4xf32>
    %c0_60 = arith.constant 0 : index
    %c0_61 = arith.constant 0 : index
    %c0_62 = arith.constant 0 : index
    %100 = vector.load %arg7[%c0_60, %c0_61, %c0_62] : memref<10x18x4xf32, #tpu.memory_space<vmem>>, vector<10x18x4xf32>
    tpu.vector_store %arg7[%c0_60, %c0_61, %c0_62], %99 {strides = array<i32>} : memref<10x18x4xf32, #tpu.memory_space<vmem>>, vector<10x18x4xf32>,
    %cst_63 = arith.constant 0.000000e+00 : f32
    %101 = vector.broadcast %cst_63 : f32 to vector<128x4xf32>
    %c0_64 = arith.constant 0 : index
    %c0_65 = arith.constant 0 : index
    %c0_66 = arith.constant 0 : index
    %102 = vector.load %arg7[%c0_64, %c0_65, %c0_66] : memref<10x18x4xf32, #tpu.memory_space<vmem>>, vector<8x16x4xf32>
    %103 = vector.shape_cast %102 : vector<8x16x4xf32> to vector<128x4xf32>
    %c0_67 = arith.constant 0 : index
    %c0_68 = arith.constant 0 : index
    %c0_69 = arith.constant 0 : index
    %104 = vector.load %arg4[%c0_67, %c0_68, %c0_69] : memref<9x4x4xf32, #tpu.memory_space<vmem>>, vector<1x4x4xf32>
    %105 = vector.shape_cast %104 : vector<1x4x4xf32> to vector<4x4xf32>
    %cst_70 = arith.constant dense<0.000000e+00> : vector<128x4xf32>
    %106 = tpu.matmul %103, %105, %cst_70 {dimension_numbers = #tpu.dot_dimension_numbers<[1], [0], [0], [1], [0, 0, 1, 1], [], []>} : vector<128x4xf32>, vector<4x4xf32>, vector<128x4xf32> -> vector<128x4xf32>
    %107 = arith.addf %101, %106 : vector<128x4xf32>
    %c0_71 = arith.constant 0 : index
    %c1_72 = arith.constant 1 : index
    %c0_73 = arith.constant 0 : index
    %108 = vector.load %arg7[%c0_71, %c1_72, %c0_73] : memref<10x18x4xf32, #tpu.memory_space<vmem>>, vector<8x16x4xf32>
    %109 = vector.shape_cast %108 : vector<8x16x4xf32> to vector<128x4xf32>
    %c1_74 = arith.constant 1 : index
    %c0_75 = arith.constant 0 : index
    %c0_76 = arith.constant 0 : index
    %110 = vector.load %arg4[%c1_74, %c0_75, %c0_76] : memref<9x4x4xf32, #tpu.memory_space<vmem>>, vector<1x4x4xf32>
    %111 = vector.shape_cast %110 : vector<1x4x4xf32> to vector<4x4xf32>
    %cst_77 = arith.constant dense<0.000000e+00> : vector<128x4xf32>
    %112 = tpu.matmul %109, %111, %cst_77 {dimension_numbers = #tpu.dot_dimension_numbers<[1], [0], [0], [1], [0, 0, 1, 1], [], []>} : vector<128x4xf32>, vector<4x4xf32>, vector<128x4xf32> -> vector<128x4xf32>
    %113 = arith.addf %107, %112 : vector<128x4xf32>
    %c0_78 = arith.constant 0 : index
    %c2_79 = arith.constant 2 : index
    %c0_80 = arith.constant 0 : index
    %114 = vector.load %arg7[%c0_78, %c2_79, %c0_80] : memref<10x18x4xf32, #tpu.memory_space<vmem>>, vector<8x16x4xf32>
    %115 = vector.shape_cast %114 : vector<8x16x4xf32> to vector<128x4xf32>
    %c2_81 = arith.constant 2 : index
    %c0_82 = arith.constant 0 : index
    %c0_83 = arith.constant 0 : index
    %116 = vector.load %arg4[%c2_81, %c0_82, %c0_83] : memref<9x4x4xf32, #tpu.memory_space<vmem>>, vector<1x4x4xf32>
    %117 = vector.shape_cast %116 : vector<1x4x4xf32> to vector<4x4xf32>
    %cst_84 = arith.constant dense<0.000000e+00> : vector<128x4xf32>
    %118 = tpu.matmul %115, %117, %cst_84 {dimension_numbers = #tpu.dot_dimension_numbers<[1], [0], [0], [1], [0, 0, 1, 1], [], []>} : vector<128x4xf32>, vector<4x4xf32>, vector<128x4xf32> -> vector<128x4xf32>
    %119 = arith.addf %113, %118 : vector<128x4xf32>
    %c1_85 = arith.constant 1 : index
    %c0_86 = arith.constant 0 : index
    %c0_87 = arith.constant 0 : index
    %120 = vector.load %arg7[%c1_85, %c0_86, %c0_87] : memref<10x18x4xf32, #tpu.memory_space<vmem>>, vector<8x16x4xf32>
    %121 = vector.shape_cast %120 : vector<8x16x4xf32> to vector<128x4xf32>
    %c3_88 = arith.constant 3 : index
    %c0_89 = arith.constant 0 : index
    %c0_90 = arith.constant 0 : index
    %122 = vector.load %arg4[%c3_88, %c0_89, %c0_90] : memref<9x4x4xf32, #tpu.memory_space<vmem>>, vector<1x4x4xf32>
    %123 = vector.shape_cast %122 : vector<1x4x4xf32> to vector<4x4xf32>
    %cst_91 = arith.constant dense<0.000000e+00> : vector<128x4xf32>
    %124 = tpu.matmul %121, %123, %cst_91 {dimension_numbers = #tpu.dot_dimension_numbers<[1], [0], [0], [1], [0, 0, 1, 1], [], []>} : vector<128x4xf32>, vector<4x4xf32>, vector<128x4xf32> -> vector<128x4xf32>
    %125 = arith.addf %119, %124 : vector<128x4xf32>
    %c1_92 = arith.constant 1 : index
    %c1_93 = arith.constant 1 : index
    %c0_94 = arith.constant 0 : index
    %126 = vector.load %arg7[%c1_92, %c1_93, %c0_94] : memref<10x18x4xf32, #tpu.memory_space<vmem>>, vector<8x16x4xf32>
    %127 = vector.shape_cast %126 : vector<8x16x4xf32> to vector<128x4xf32>
    %c4_95 = arith.constant 4 : index
    %c0_96 = arith.constant 0 : index
    %c0_97 = arith.constant 0 : index
    %128 = vector.load %arg4[%c4_95, %c0_96, %c0_97] : memref<9x4x4xf32, #tpu.memory_space<vmem>>, vector<1x4x4xf32>
    %129 = vector.shape_cast %128 : vector<1x4x4xf32> to vector<4x4xf32>
    %cst_98 = arith.constant dense<0.000000e+00> : vector<128x4xf32>
    %130 = tpu.matmul %127, %129, %cst_98 {dimension_numbers = #tpu.dot_dimension_numbers<[1], [0], [0], [1], [0, 0, 1, 1], [], []>} : vector<128x4xf32>, vector<4x4xf32>, vector<128x4xf32> -> vector<128x4xf32>
    %131 = arith.addf %125, %130 : vector<128x4xf32>
    %c1_99 = arith.constant 1 : index
    %c2_100 = arith.constant 2 : index
    %c0_101 = arith.constant 0 : index
    %132 = vector.load %arg7[%c1_99, %c2_100, %c0_101] : memref<10x18x4xf32, #tpu.memory_space<vmem>>, vector<8x16x4xf32>
    %133 = vector.shape_cast %132 : vector<8x16x4xf32> to vector<128x4xf32>
    %c5_102 = arith.constant 5 : index
    %c0_103 = arith.constant 0 : index
    %c0_104 = arith.constant 0 : index
    %134 = vector.load %arg4[%c5_102, %c0_103, %c0_104] : memref<9x4x4xf32, #tpu.memory_space<vmem>>, vector<1x4x4xf32>
    %135 = vector.shape_cast %134 : vector<1x4x4xf32> to vector<4x4xf32>
    %cst_105 = arith.constant dense<0.000000e+00> : vector<128x4xf32>
    %136 = tpu.matmul %133, %135, %cst_105 {dimension_numbers = #tpu.dot_dimension_numbers<[1], [0], [0], [1], [0, 0, 1, 1], [], []>} : vector<128x4xf32>, vector<4x4xf32>, vector<128x4xf32> -> vector<128x4xf32>
    %137 = arith.addf %131, %136 : vector<128x4xf32>
    %c2_106 = arith.constant 2 : index
    %c0_107 = arith.constant 0 : index
    %c0_108 = arith.constant 0 : index
    %138 = vector.load %arg7[%c2_106, %c0_107, %c0_108] : memref<10x18x4xf32, #tpu.memory_space<vmem>>, vector<8x16x4xf32>
    %139 = vector.shape_cast %138 : vector<8x16x4xf32> to vector<128x4xf32>
    %c6_109 = arith.constant 6 : index
    %c0_110 = arith.constant 0 : index
    %c0_111 = arith.constant 0 : index
    %140 = vector.load %arg4[%c6_109, %c0_110, %c0_111] : memref<9x4x4xf32, #tpu.memory_space<vmem>>, vector<1x4x4xf32>
    %141 = vector.shape_cast %140 : vector<1x4x4xf32> to vector<4x4xf32>
    %cst_112 = arith.constant dense<0.000000e+00> : vector<128x4xf32>
    %142 = tpu.matmul %139, %141, %cst_112 {dimension_numbers = #tpu.dot_dimension_numbers<[1], [0], [0], [1], [0, 0, 1, 1], [], []>} : vector<128x4xf32>, vector<4x4xf32>, vector<128x4xf32> -> vector<128x4xf32>
    %143 = arith.addf %137, %142 : vector<128x4xf32>
    %c2_113 = arith.constant 2 : index
    %c1_114 = arith.constant 1 : index
    %c0_115 = arith.constant 0 : index
    %144 = vector.load %arg7[%c2_113, %c1_114, %c0_115] : memref<10x18x4xf32, #tpu.memory_space<vmem>>, vector<8x16x4xf32>
    %145 = vector.shape_cast %144 : vector<8x16x4xf32> to vector<128x4xf32>
    %c7_116 = arith.constant 7 : index
    %c0_117 = arith.constant 0 : index
    %c0_118 = arith.constant 0 : index
    %146 = vector.load %arg4[%c7_116, %c0_117, %c0_118] : memref<9x4x4xf32, #tpu.memory_space<vmem>>, vector<1x4x4xf32>
    %147 = vector.shape_cast %146 : vector<1x4x4xf32> to vector<4x4xf32>
    %cst_119 = arith.constant dense<0.000000e+00> : vector<128x4xf32>
    %148 = tpu.matmul %145, %147, %cst_119 {dimension_numbers = #tpu.dot_dimension_numbers<[1], [0], [0], [1], [0, 0, 1, 1], [], []>} : vector<128x4xf32>, vector<4x4xf32>, vector<128x4xf32> -> vector<128x4xf32>
    %149 = arith.addf %143, %148 : vector<128x4xf32>
    %c2_120 = arith.constant 2 : index
    %c2_121 = arith.constant 2 : index
    %c0_122 = arith.constant 0 : index
    %150 = vector.load %arg7[%c2_120, %c2_121, %c0_122] : memref<10x18x4xf32, #tpu.memory_space<vmem>>, vector<8x16x4xf32>
    %151 = vector.shape_cast %150 : vector<8x16x4xf32> to vector<128x4xf32>
    %c8_123 = arith.constant 8 : index
    %c0_124 = arith.constant 0 : index
    %c0_125 = arith.constant 0 : index
    %152 = vector.load %arg4[%c8_123, %c0_124, %c0_125] : memref<9x4x4xf32, #tpu.memory_space<vmem>>, vector<1x4x4xf32>
    %153 = vector.shape_cast %152 : vector<1x4x4xf32> to vector<4x4xf32>
    %cst_126 = arith.constant dense<0.000000e+00> : vector<128x4xf32>
    %154 = tpu.matmul %151, %153, %cst_126 {dimension_numbers = #tpu.dot_dimension_numbers<[1], [0], [0], [1], [0, 0, 1, 1], [], []>} : vector<128x4xf32>, vector<4x4xf32>, vector<128x4xf32> -> vector<128x4xf32>
    %155 = arith.addf %149, %154 : vector<128x4xf32>
    %c0_127 = arith.constant 0 : index
    %156 = arith.index_cast %1 : i32 to index
    %c0_128 = arith.constant 0 : index
    %c0_129 = arith.constant 0 : index
    %157 = vector.load %arg2[%c0_127, %156, %c0_128, %c0_129] : memref<1x16x16x4xf32, #tpu.memory_space<vmem>>, vector<1x8x16x4xf32>
    %158 = vector.shape_cast %157 : vector<1x8x16x4xf32> to vector<8x16x4xf32>
    %159 = vector.shape_cast %158 : vector<8x16x4xf32> to vector<128x4xf32>
    %160 = arith.addf %155, %159 : vector<128x4xf32>
    %cst_130 = arith.constant 0.000000e+00 : f32
    %161 = vector.broadcast %cst_130 : f32 to vector<128x4xf32>
    %162 = arith.minimumf %160, %161 : vector<128x4xf32>
    %cst_131 = arith.constant 0.000000e+00 : f32
    %163 = vector.broadcast %cst_131 : f32 to vector<128x4xf32>
    %164 = arith.cmpf ogt, %160, %163 : vector<128x4xf32>
    %165 = math.exp %162 : vector<128x4xf32>
    %cst_132 = arith.constant 1.000000e+00 : f32
    %166 = vector.broadcast %cst_132 : f32 to vector<128x4xf32>
    %167 = arith.subf %165, %166 : vector<128x4xf32>
    %168 = arith.select %164, %160, %167 : vector<128x4xi1>, vector<128x4xf32>
    %169 = vector.shape_cast %168 : vector<128x4xf32> to vector<8x16x4xf32>
    %c0_133 = arith.constant 0 : index
    %c0_134 = arith.constant 0 : index
    %c0_135 = arith.constant 0 : index
    %c0_136 = arith.constant 0 : index
    %170 = vector.load %arg5[%c0_133, %c0_134, %c0_135, %c0_136] : memref<1x8x16x4xf32, #tpu.memory_space<vmem>>, vector<1x8x16x4xf32>
    %171 = vector.shape_cast %170 : vector<1x8x16x4xf32> to vector<8x16x4xf32>
    %172 = vector.shape_cast %169 : vector<8x16x4xf32> to vector<1x8x16x4xf32>
    tpu.vector_store %arg5[%c0_133, %c0_134, %c0_135, %c0_136], %172 {strides = array<i32>} : memref<1x8x16x4xf32, #tpu.memory_space<vmem>>, vector<1x8x16x4xf32>,
    return
  }
  func.func @transform_0(%arg0: i32, %arg1: i32) -> (i32, i32, i32, i32) {
    %c0_i32 = arith.constant 0 : i32
    %c0_i32_0 = arith.constant 0 : i32
    %c0_i32_1 = arith.constant 0 : i32
    %c0_i32_2 = arith.constant 0 : i32
    return %arg0, %c0_i32, %c0_i32_0, %c0_i32_1 : i32, i32, i32, i32
  }
  func.func @transform_1(%arg0: i32, %arg1: i32) -> (i32, i32, i32) {
    %c0_i32 = arith.constant 0 : i32
    %c0_i32_0 = arith.constant 0 : i32
    %c0_i32_1 = arith.constant 0 : i32
    %c0_i32_2 = arith.constant 0 : i32
    return %c0_i32, %c0_i32_0, %c0_i32_1 : i32, i32, i32
  }
  func.func @transform_2(%arg0: i32, %arg1: i32) -> (i32, i32, i32) {
    %c0_i32 = arith.constant 0 : i32
    %c0_i32_0 = arith.constant 0 : i32
    %c0_i32_1 = arith.constant 0 : i32
    %c0_i32_2 = arith.constant 0 : i32
    return %c0_i32, %c0_i32_0, %c0_i32_1 : i32, i32, i32
  }
  func.func @transform_3(%arg0: i32, %arg1: i32) -> (i32, i32, i32, i32) {
    %c0_i32 = arith.constant 0 : i32
    %c0_i32_0 = arith.constant 0 : i32
    %c0_i32_1 = arith.constant 0 : i32
    return %arg0, %arg1, %c0_i32, %c0_i32_0 : i32, i32, i32, i32
  }
}

</mosaic_0001>

<bundles_post_ra>
// kernel: tpu_custom_call.1
= control target key start
LH: loop header
LB: loop body
LE: loop exit
PB: predicated region body
PF: predicated region fallthrough
CT: control target
= control target key end

     0   :  { %s7321_s12 = smov 0   ;;  %s7323_s13 = smov 0   ;;  %s9001_s0 = inlined_call_operand.vmem [shape: f32[2,16,16,4], index: 0, kind: input, shape index: {}]   ;;  %s9002_s1 = inlined_call_operand.vmem [shape: f32[9,4,4], index: 1, kind: input, shape index: {}]   ;;  %s9003_s2 = inlined_call_operand.vmem [shape: f32[9,4,4], index: 2, kind: input, shape index: {}]   ;;  %s9004_s3 = inlined_call_operand.vmem [shape: f32[2,16,16,4], index: 3, kind: output, shape index: {}]  }
   0x1   :  { %s7325_s14 = smov 0   ;;  %s7327_s15 = smov 0  }
   0x2   :  { %s7329_s16 = smov 0  }
   0x3 LB: > { %s22_s17 = sadd.s32 1, %s7290_s14  ;;  %s25_s18 = sadd.s32 1, %s7294_s15  ;;  %s7298_s16 = sphi %s7329_s16, %s13_s16   ;;  %s7294_s15 = sphi %s7327_s15, %s9028_s15   ;;  %s7290_s14 = sphi %s7325_s14, %s9027_s14   ;;  %s7286_s13 = sphi %s7323_s13, %s9026_s13   ;;  %s7282_s12 = sphi %s7321_s12, %s9025_s12  }
   0x4   : > { %p23_p0 = scmp.ge.s32.totalorder %s22_s17, 2  ;;  %p5459_p1 = scmp.ge.s32.totalorder %s7298_s16, 1 }
   0x5   : > { %p151_p2 = scmp.lt.s32.totalorder %s7298_s16, 5 }
   0x6   : > { %s9030_s17 = smov (%p23_p0, %s22_s17), 0  ;;  %s9032_s18 = smov (!%p23_p0, %s25_s18), %s7294_s15 }
   0x7   : > { %p152_p3 = pnand %p5459_p1, %p151_p2  ;;  %p27_p4 = scmp.ge.s32.totalorder %s9032_s18, 2 }
   0x8   : > { %p180_p5 = scmp.lt.s32.totalorder (!%p152_p3), %s7286_s13, 1  ;;  %s7354_s19 = sshll.u32 (!%p152_p3), %s7282_s12, 3 }
   0x9   : > { %s9034_s18 = smov (%p27_p4, %s9032_s18), 0  ;;  %155 = sbr.rel (%p152_p3) target bundleno = 1121 (0x461), region = 32 }
   0xa   : > { %p188_p6 = scmp.lt.s32.totalorder (!%p152_p3), %s7354_s19, 15  ;;  %p5467_p7 = scmp.ne.s32.totalorder (!%p152_p3), %s7282_s12, 0 }
  0x10   : > { %s9036_s13 = smov (!%p180_p5, %s7286_s13), 1  ;;  %200 = sbr.rel (%p5467_p7) target bundleno = 53 (0x35), region = 36 }
  0x11   : > { %s189_s20 = scalar_select %p188_p6, %s7354_s19, 15 }
  0x12   : > { %s5991_s21 = sshll.u32 %s9036_s13, 8  ;;  %s5464_s22 = sshll.u32 %s9036_s13, 5  ;;  %vm394_vm0 = vcmask (!%p5467_p7), 31744   ;;  %vm397_vm1 = vcmask (!%p5467_p7), 25600   ;;  %vm265_vm2 = vcmask (!%p5467_p7), 1040384   ;;  %v7300_v2 = vmov (!%p5467_p7), 0.0  }
  0x13   : > { %s7361_s25 = scalar_lea.vmem %s9001_s0, %s5991_s21  ;;  %s5463_s26 = sshll.u32 %s189_s20, 1  ;;  %395 = vst.msk [vmem:[#allocation2] sm:$0xff] (!%p5467_p7), %vm394_vm0, %v7300_v2  ;;  %396 = vst.msk [vmem:[#allocation2 + $0x8] sm:$0xff] (!%p5467_p7), %vm394_vm0, %v7300_v2 }
  0x14   : > { %s192_s27 = sadd.s32 %s5464_s22, %s5463_s26  ;;  %v201_v0 = vld [vmem:[%s7361_s25] sm:$0xff] (!%p5467_p7)  ;;  %v202_v1 = vld [vmem:[%s7361_s25 + $0x8] sm:$0xff] (!%p5467_p7)  ;;  %399 = vst.msk [vmem:[#allocation2 + $0x18] sm:$0xff] (!%p5467_p7), %vm394_vm0, %v7300_v2  ;;  %400 = vst.msk [vmem:[#allocation2 + $0x20] sm:$0xff] (!%p5467_p7), %vm394_vm0, %v7300_v2 }
  0x15   : > { %s5465_s28 = sshll.u32 %s192_s27, 3  ;;  %450 = vst.msk [vmem:[#allocation2 + $0x1b0] sm:$0xff] (!%p5467_p7), %vm394_vm0, %v7300_v2  ;;  %451 = vst.msk [vmem:[#allocation2 + $0x1b8] sm:$0xff] (!%p5467_p7), %vm394_vm0, %v7300_v2  ;;  %v266_v3 = vrot.slane (!%p5467_p7), %v201_v0, 7  ;;  %v267_v4 = vrot.slane (!%p5467_p7), %v202_v1, 7  ;;  %v203_v5 = vld [vmem:[%s7361_s25 + $0x10] sm:$0xff] (!%p5467_p7) }
  0x16   : > { %s7366_s4 = scalar_lea.vmem %s9004_s3, %s5465_s28  ;;  %453 = vst.msk [vmem:[#allocation2 + $0x1c8] sm:$0xff] (!%p5467_p7), %vm394_vm0, %v7300_v2  ;;  %454 = vst.msk [vmem:[#allocation2 + $0x1d0] sm:$0xff] (!%p5467_p7), %vm394_vm0, %v7300_v2  ;;  %v204_v6 = vld [vmem:[%s7361_s25 + $0x18] sm:$0xff] (!%p5467_p7)  ;;  %v205_v7 = vld [vmem:[%s7361_s25 + $0x20] sm:$0xff] (!%p5467_p7)  ;;  %v269_v8 = vrot.slane (!%p5467_p7), %v203_v5, 7 }
  0x17   : > { %398 = vst.msk [vmem:[#allocation2 + $0x10] sm:$0x3] %vm397_vm1, %v7300_v2  ;;  %401 = vst.msk [vmem:[#allocation2 + $0x28] sm:$0x3] %vm397_vm1, %v7300_v2  ;;  %v270_v9 = vrot.slane %v204_v6, 7  ;;  %v272_v10 = vrot.slane %v205_v7, 7  ;;  %v268_v15 = vsel %vm265_vm2, %v266_v3, %v267_v4 }
  0x18   : > { %452 = vst.msk [vmem:[#allocation2 + $0x1c0] sm:$0x3] %vm397_vm1, %v7300_v2  ;;  %455 = vst.msk [vmem:[#allocation2 + $0x1d8] sm:$0x3] %vm397_vm1, %v7300_v2  ;;  %v206_v11 = vld [vmem:[%s7361_s25 + $0x28] sm:$0xff]  ;;  %v207_v12 = vld [vmem:[%s7361_s25 + $0x30] sm:$0xff] }
  0x19   : > { %v208_v13 = vld [vmem:[%s7361_s25 + $0x38] sm:$0xff]  ;;  %v362_v14 = vsel %vm265_vm2, 0.0, %v266_v3  ;;  %v378_v16 = vsel %vm265_vm2, %v267_v4, 0.0  ;;  %v273_v17 = vrot.slane %v206_v11, 7  ;;  %v209_v18 = vld [vmem:[%s7361_s25 + $0x40] sm:$0xff]  ;;  %v210_v19 = vld [vmem:[%s7361_s25 + $0x48] sm:$0xff]  ;;  %v271_v22 = vsel %vm265_vm2, %v269_v8, %v270_v9 }
  0x1a   : > { %v211_v20 = vld [vmem:[%s7361_s25 + $0x50] sm:$0xff]  ;;  %402 = vst.msk [vmem:[#allocation2 + $0x30] sm:$0xff] %vm394_vm0, %v362_v14  ;;  %403 = vst.msk [vmem:[#allocation2 + $0x38] sm:$0xff] %vm394_vm0, %v268_v15  ;;  %v363_v21 = vsel %vm265_vm2, 0.0, %v269_v8  ;;  %v379_v23 = vsel %vm265_vm2, %v270_v9, 0.0  ;;  %v364_v24 = vsel %vm265_vm2, 0.0, %v272_v10 }
  0x1b   : > { %404 = vst.msk [vmem:[#allocation2 + $0x40] sm:$0x3] %vm397_vm1, %v378_v16  ;;  %v212_v25 = vld [vmem:[%s7361_s25 + $0x58] sm:$0xff]  ;;  %v213_v26 = vld [vmem:[%s7361_s25 + $0x60] sm:$0xff]  ;;  %407 = vst.msk [vmem:[#allocation2 + $0x58] sm:$0x3] %vm397_vm1, %v379_v23  ;;  %v274_v27 = vsel %vm265_vm2, %v272_v10, %v273_v17 }
  0x1c   : > { %405 = vst.msk [vmem:[#allocation2 + $0x48] sm:$0xff] %vm394_vm0, %v363_v21  ;;  %406 = vst.msk [vmem:[#allocation2 + $0x50] sm:$0xff] %vm394_vm0, %v271_v22  ;;  %v380_v28 = vsel %vm265_vm2, %v273_v17, 0.0  ;;  %v275_v29 = vrot.slane %v207_v12, 7  ;;  %v276_v30 = vrot.slane %v208_v13, 7  ;;  %v278_v31 = vrot.slane %v209_v18, 7 }
  0x1d   : > { %408 = vst.msk [vmem:[#allocation2 + $0x60] sm:$0xff] %vm394_vm0, %v364_v24  ;;  %409 = vst.msk [vmem:[#allocation2 + $0x68] sm:$0xff] %vm394_vm0, %v274_v27  ;;  %v279_v32 = vrot.slane %v210_v19, 7  ;;  %v281_v33 = vrot.slane %v211_v20, 7  ;;  %v282_v34 = vrot.slane %v212_v25, 7  ;;  %v214_v35 = vld [vmem:[%s7361_s25 + $0x68] sm:$0xff] }
  0x1e   : > { %410 = vst.msk [vmem:[#allocation2 + $0x70] sm:$0x3] %vm397_vm1, %v380_v28  ;;  %v215_v36 = vld [vmem:[%s7361_s25 + $0x70] sm:$0xff]  ;;  %v365_v37 = vsel %vm265_vm2, 0.0, %v275_v29  ;;  %v277_v38 = vsel %vm265_vm2, %v275_v29, %v276_v30  ;;  %v381_v39 = vsel %vm265_vm2, %v276_v30, 0.0  ;;  %v284_v40 = vrot.slane %v213_v26, 7 }
  0x1f   : > { %v216_v41 = vld [vmem:[%s7361_s25 + $0x78] sm:$0xff]  ;;  %v217_v42 = vld [vmem:[%s7361_s25 + $0x80] sm:$0xff]  ;;  %v218_v43 = vld [vmem:[%s7361_s25 + $0x88] sm:$0xff]  ;;  %411 = vst.msk [vmem:[#allocation2 + $0x78] sm:$0xff] %vm394_vm0, %v365_v37  ;;  %v366_v44 = vsel %vm265_vm2, 0.0, %v278_v31  ;;  %v280_v45 = vsel %vm265_vm2, %v278_v31, %v279_v32  ;;  %v382_v46 = vsel %vm265_vm2, %v279_v32, 0.0  ;;  %v283_v50 = vsel %vm265_vm2, %v281_v33, %v282_v34 }
  0x20   : > { %412 = vst.msk [vmem:[#allocation2 + $0x80] sm:$0xff] %vm394_vm0, %v277_v38  ;;  %v367_v47 = vsel %vm265_vm2, 0.0, %v281_v33  ;;  %v219_v48 = vld [vmem:[%s7361_s25 + $0x90] sm:$0xff]  ;;  %v220_v49 = vld [vmem:[%s7361_s25 + $0x98] sm:$0xff]  ;;  %414 = vst.msk [vmem:[#allocation2 + $0x90] sm:$0xff] %vm394_vm0, %v366_v44  ;;  %v383_v51 = vsel %vm265_vm2, %v282_v34, 0.0 }
  0x21   : > { %413 = vst.msk [vmem:[#allocation2 + $0x88] sm:$0x3] %vm397_vm1, %v381_v39  ;;  %416 = vst.msk [vmem:[#allocation2 + $0xa0] sm:$0x3] %vm397_vm1, %v382_v46  ;;  %v368_v52 = vsel %vm265_vm2, 0.0, %v284_v40  ;;  %v285_v53 = vrot.slane %v214_v35, 7 }
  0x22   : > { %415 = vst.msk [vmem:[#allocation2 + $0x98] sm:$0xff] %vm394_vm0, %v280_v45  ;;  %417 = vst.msk [vmem:[#allocation2 + $0xa8] sm:$0xff] %vm394_vm0, %v367_v47  ;;  %v287_v54 = vrot.slane %v215_v36, 7  ;;  %v288_v55 = vrot.slane %v216_v41, 7  ;;  %v290_v56 = vrot.slane %v217_v42, 7  ;;  %v291_v57 = vrot.slane %v218_v43, 7 }
  0x23   : > { %418 = vst.msk [vmem:[#allocation2 + $0xb0] sm:$0xff] %vm394_vm0, %v283_v50  ;;  %420 = vst.msk [vmem:[#allocation2 + $0xc0] sm:$0xff] %vm394_vm0, %v368_v52  ;;  %v221_v58 = vld [vmem:[%s7361_s25 + $0xa0] sm:$0xff]  ;;  %v286_v59 = vsel %vm265_vm2, %v284_v40, %v285_v53  ;;  %v384_v60 = vsel %vm265_vm2, %v285_v53, 0.0  ;;  %v293_v61 = vrot.slane %v219_v48, 7  ;;  %v294_v62 = vrot.slane %v220_v49, 7 }
  0x24   : > { %419 = vst.msk [vmem:[#allocation2 + $0xb8] sm:$0x3] %vm397_vm1, %v383_v51  ;;  %v222_v63 = vld [vmem:[%s7361_s25 + $0xa8] sm:$0xff]  ;;  %v223_v0 = vld [vmem:[%s7361_s25 + $0xb0] sm:$0xff]  ;;  %v224_v1 = vld [vmem:[%s7361_s25 + $0xb8] sm:$0xff]  ;;  %v369_v2 = vsel %vm265_vm2, 0.0, %v287_v54  ;;  %v289_v3 = vsel %vm265_vm2, %v287_v54, %v288_v55  ;;  %v292_v9 = vsel %vm265_vm2, %v290_v56, %v291_v57 }
  0x25   : > { %421 = vst.msk [vmem:[#allocation2 + $0xc8] sm:$0xff] %vm394_vm0, %v286_v59  ;;  %v385_v4 = vsel %vm265_vm2, %v288_v55, 0.0  ;;  %v370_v5 = vsel %vm265_vm2, 0.0, %v290_v56  ;;  %v225_v6 = vld [vmem:[%s7361_s25 + $0xc0] sm:$0xff]  ;;  %v226_v7 = vld [vmem:[%s7361_s25 + $0xc8] sm:$0xff]  ;;  %v227_v8 = vld [vmem:[%s7361_s25 + $0xd0] sm:$0xff]  ;;  %v295_v12 = vsel %vm265_vm2, %v293_v61, %v294_v62 }
  0x26   : > { %422 = vst.msk [vmem:[#allocation2 + $0xd0] sm:$0x3] %vm397_vm1, %v384_v60  ;;  %425 = vst.msk [vmem:[#allocation2 + $0xe8] sm:$0x3] %vm397_vm1, %v385_v4  ;;  %v386_v10 = vsel %vm265_vm2, %v291_v57, 0.0  ;;  %v371_v11 = vsel %vm265_vm2, 0.0, %v293_v61 }
  0x27   : > { %423 = vst.msk [vmem:[#allocation2 + $0xd8] sm:$0xff] %vm394_vm0, %v369_v2  ;;  %424 = vst.msk [vmem:[#allocation2 + $0xe0] sm:$0xff] %vm394_vm0, %v289_v3  ;;  %v387_v13 = vsel %vm265_vm2, %v294_v62, 0.0  ;;  %v296_v14 = vrot.slane %v221_v58, 7  ;;  %v297_v15 = vrot.slane %v222_v63, 7  ;;  %v299_v16 = vrot.slane %v223_v0, 7 }
  0x28   : > { %426 = vst.msk [vmem:[#allocation2 + $0xf0] sm:$0xff] %vm394_vm0, %v370_v5  ;;  %427 = vst.msk [vmem:[#allocation2 + $0xf8] sm:$0xff] %vm394_vm0, %v292_v9  ;;  %v300_v17 = vrot.slane %v224_v1, 7  ;;  %v302_v18 = vrot.slane %v225_v6, 7  ;;  %v303_v19 = vrot.slane %v226_v7, 7  ;;  %v305_v20 = vrot.slane %v227_v8, 7 }
  0x29   : > { %428 = vst.msk [vmem:[#allocation2 + $0x100] sm:$0x3] %vm397_vm1, %v386_v10  ;;  %431 = vst.msk [vmem:[#allocation2 + $0x118] sm:$0x3] %vm397_vm1, %v387_v13  ;;  %v228_v21 = vld [vmem:[%s7361_s25 + $0xd8] sm:$0xff]  ;;  %v229_v22 = vld [vmem:[%s7361_s25 + $0xe0] sm:$0xff]  ;;  %v298_v24 = vsel %vm265_vm2, %v296_v14, %v297_v15 }
  0x2a   : > { %429 = vst.msk [vmem:[#allocation2 + $0x108] sm:$0xff] %vm394_vm0, %v371_v11  ;;  %430 = vst.msk [vmem:[#allocation2 + $0x110] sm:$0xff] %vm394_vm0, %v295_v12  ;;  %v372_v23 = vsel %vm265_vm2, 0.0, %v296_v14  ;;  %v388_v25 = vsel %vm265_vm2, %v297_v15, 0.0  ;;  %v373_v26 = vsel %vm265_vm2, 0.0, %v299_v16  ;;  %v230_v27 = vld [vmem:[%s7361_s25 + $0xe8] sm:$0xff]  ;;  %v301_v30 = vsel %vm265_vm2, %v299_v16, %v300_v17 }
  0x2b   : > { %v231_v28 = vld [vmem:[%s7361_s25 + $0xf0] sm:$0xff]  ;;  %v232_v29 = vld [vmem:[%s7361_s25 + $0xf8] sm:$0xff]  ;;  %432 = vst.msk [vmem:[#allocation2 + $0x120] sm:$0xff] %vm394_vm0, %v372_v23  ;;  %433 = vst.msk [vmem:[#allocation2 + $0x128] sm:$0xff] %vm394_vm0, %v298_v24  ;;  %v389_v31 = vsel %vm265_vm2, %v300_v17, 0.0  ;;  %v374_v32 = vsel %vm265_vm2, 0.0, %v302_v18  ;;  %v304_v33 = vsel %vm265_vm2, %v302_v18, %v303_v19 }
  0x2c   : > { %434 = vst.msk [vmem:[#allocation2 + $0x130] sm:$0x3] %vm397_vm1, %v388_v25  ;;  %437 = vst.msk [vmem:[#allocation2 + $0x148] sm:$0x3] %vm397_vm1, %v389_v31  ;;  %v390_v34 = vsel %vm265_vm2, %v303_v19, 0.0  ;;  %v375_v35 = vsel %vm265_vm2, 0.0, %v305_v20 }
  0x2d   : > { %435 = vst.msk [vmem:[#allocation2 + $0x138] sm:$0xff] %vm394_vm0, %v373_v26  ;;  %436 = vst.msk [vmem:[#allocation2 + $0x140] sm:$0xff] %vm394_vm0, %v301_v30  ;;  %v306_v36 = vrot.slane %v228_v21, 7  ;;  %v308_v37 = vrot.slane %v229_v22, 7  ;;  %v309_v38 = vrot.slane %v230_v27, 7  ;;  %v311_v39 = vrot.slane %v231_v28, 7 }
  0x2e   : > { %438 = vst.msk [vmem:[#allocation2 + $0x150] sm:$0xff] %vm394_vm0, %v374_v32  ;;  %439 = vst.msk [vmem:[#allocation2 + $0x158] sm:$0xff] %vm394_vm0, %v304_v33  ;;  %v312_v40 = vrot.slane %v232_v29, 7 }
  0x2f   : > { %440 = vst.msk [vmem:[#allocation2 + $0x160] sm:$0x3] %vm397_vm1, %v390_v34  ;;  %v307_v41 = vsel %vm265_vm2, %v305_v20, %v306_v36  ;;  %v391_v42 = vsel %vm265_vm2, %v306_v36, 0.0  ;;  %v376_v43 = vsel %vm265_vm2, 0.0, %v308_v37  ;;  %v310_v44 = vsel %vm265_vm2, %v308_v37, %v309_v38 }
  0x30   : > { %441 = vst.msk [vmem:[#allocation2 + $0x168] sm:$0xff] %vm394_vm0, %v375_v35  ;;  %442 = vst.msk [vmem:[#allocation2 + $0x170] sm:$0xff] %vm394_vm0, %v307_v41  ;;  %v392_v45 = vsel %vm265_vm2, %v309_v38, 0.0  ;;  %v377_v46 = vsel %vm265_vm2, 0.0, %v311_v39  ;;  %v313_v47 = vsel %vm265_vm2, %v311_v39, %v312_v40  ;;  %v393_v48 = vsel %vm265_vm2, %v312_v40, 0.0 }
  0x31   : > { %443 = vst.msk [vmem:[#allocation2 + $0x178] sm:$0x3] %vm397_vm1, %v391_v42  ;;  %446 = vst.msk [vmem:[#allocation2 + $0x190] sm:$0x3] %vm397_vm1, %v392_v45 }
  0x32   : > { %444 = vst.msk [vmem:[#allocation2 + $0x180] sm:$0xff] %vm394_vm0, %v376_v43  ;;  %445 = vst.msk [vmem:[#allocation2 + $0x188] sm:$0xff] %vm394_vm0, %v310_v44 }
  0x33   : > { %447 = vst.msk [vmem:[#allocation2 + $0x198] sm:$0xff] %vm394_vm0, %v377_v46  ;;  %448 = vst.msk [vmem:[#allocation2 + $0x1a0] sm:$0xff] %vm394_vm0, %v313_v47 }
  0x34   : > { %449 = vst.msk [vmem:[#allocation2 + $0x1a8] sm:$0x3] %vm397_vm1, %v393_v48 }
  0x35 PF: > { %v5469_v49 = vld [vmem:[%s9002_s1 + $0x4] sm:$0xf]  ;;  %vm562_vm3 = vcmask 1043456   ;;  %s5468_s7 = smul.u32 192, %s7282_s12  ;;  %vm501_vm4 = vcmask 31744   ;;  %s5810_s11 = sadd.s32 4294967295, %s7354_s19 }
  0x36   : > { %6335 = vmatprep.subr.msk.mxu0 %vm562_vm3, %v5469_v49  ;;  %v478_v50 = vld [vmem:[%s9002_s1] sm:$0xf]  ;;  %6857 = vmatprep.subr.msk.mxu1 %vm562_vm3, %v5469_v49  ;;  %v5512_v54 = vld [vmem:[%s9002_s1 + $0x8] sm:$0xf]  ;;  %v7541_v57 = vld [vmem:[%s9002_s1 + $0xc] sm:$0xf] }
  0x37   : > { %6336 = vmatpush3.msk.msra.mxu0 %vm562_vm3, %v5469_v49  ;;  %6858 = vmatpush3.msk.msra.mxu1 %vm562_vm3, %v5469_v49  ;;  %s7520_s10 = scalar_lea.vmem [#allocation2], %s5468_s7  ;;  %v5598_v32 = vld [vmem:[%s9002_s1 + $0x10] sm:$0xf]  ;;  %vm3056_vm7 = vcmask 1040384   ;;  %vm3139_vm8 = vcmask 25600   ;;  %s5992_s7 = sshll.u32 %s7282_s12, 7 }
  0x38   : > { %6367 = vmatprep.subr.msk.mxu0 %vm562_vm3, %v478_v50  ;;  %s8871_s8 = scalar_lea.vmem %s7361_s25, %s5992_s7 }
  0x3b   : > { %v479_v51 = vld [vmem:[%s7520_s10 + $0x1] sm:$0xff]  ;;  %v480_v52 = vld [vmem:[%s7520_s10 + $0x9] sm:$0xff]  ;;  %v7536_v56 = vld [vmem:[%s7520_s10 + $0x18] sm:$0xff] }
  0x3c   : > { %v458_v53 = vld [vmem:[%s7520_s10] sm:$0xff]  ;;  %6337 = vmatprep.mubr.msk.f32.mxu0 %vm501_vm4, %v479_v51  ;;  %v459_v55 = vld [vmem:[%s7520_s10 + $0x8] sm:$0xff]  ;;  %v7551_v59 = vld [vmem:[%s7520_s10 + $0x30] sm:$0xff] }
  0x3d   : > { %6338 = vmatmul.mubr.msk.f32.vlgmr.msra.gmra.mrb[0].mxu0 %vm501_vm4, %v480_v52  ;;  %v7548_v58 = vld [vmem:[%s7520_s10 + $0x20] sm:$0xff]  ;;  %v7563_v61 = vld [vmem:[%s7520_s10 + $0x38] sm:$0xff]  ;;  %v7571_v63 = vld [vmem:[%s7520_s10 + $0x48] sm:$0xff] }
  0x3e   : > { %6368 = vmatpush3.msk.msra.mxu0 %vm562_vm3, %v478_v50  ;;  %6369 = vmatprep.mubr.msk.f32.mxu0 %vm501_vm4, %v458_v53  ;;  %v7558_v60 = vld [vmem:[%s7520_s10 + $0x19] sm:$0xff]  ;;  %v7566_v62 = vld [vmem:[%s7520_s10 + $0x21] sm:$0xff]  ;;  %v7574_v0 = vld [vmem:[%s7520_s10 + $0x31] sm:$0xff] }
  0x3f   : > { %6399 = vmatprep.subr.msk.mxu0 %vm562_vm3, %v5512_v54  ;;  %6340 = vmatprep.mubr.msk.f32.mxu1 %vm501_vm4, %v7558_v60  ;;  %v7585_v1 = vld [vmem:[%s7520_s10 + $0x50] sm:$0xff]  ;;  %v7588_v2 = vld [vmem:[%s7520_s10 + $0x39] sm:$0xff]  ;;  %v7605_v5 = vld [vmem:[%s7520_s10 + $0x68] sm:$0xff] }
  0x40   : > { %6341 = vmatmul.mubr.msk.f32.vlgmr.msra.gmra.mrb[0].mxu1 %vm501_vm4, %v7566_v62  ;;  %v7591_v3 = vld [vmem:[%s7520_s10 + $0x60] sm:$0xff]  ;;  %v7594_v4 = vld [vmem:[%s7520_s10 + $0x49] sm:$0xff]  ;;  %v7608_v6 = vld [vmem:[%s7520_s10 + $0x51] sm:$0xff] }
  0x41   : > { %6343 = vmatprep.mubr.msk.f32.mxu1 %vm501_vm4, %v7574_v0  ;;  %v7611_v7 = vld [vmem:[%s7520_s10 + $0x78] sm:$0xff]  ;;  %v7614_v8 = vld [vmem:[%s7520_s10 + $0x61] sm:$0xff]  ;;  %v7628_v10 = vld [vmem:[%s7520_s10 + $0x69] sm:$0xff] }
  0x42   : > { %v7625_v9 = vld [vmem:[%s7520_s10 + $0x80] sm:$0xff]  ;;  %v7631_v11 = vld [vmem:[%s7520_s10 + $0x90] sm:$0xff]  ;;  %v7645_v13 = vld [vmem:[%s7520_s10 + $0x98] sm:$0xff] }
  0x43   : > { %v7634_v12 = vld [vmem:[%s7520_s10 + $0x79] sm:$0xff]  ;;  %v7648_v14 = vld [vmem:[%s7520_s10 + $0x81] sm:$0xff]  ;;  %v7654_v16 = vld [vmem:[%s7520_s10 + $0x91] sm:$0xff] }
  0x44   : > { %6344 = vmatmul.mubr.msk.f32.gmra.mrb[2].mxu1 %vm501_vm4, %v7588_v2  ;;  %v7651_v15 = vld [vmem:[%s7520_s10 + $0xa8] sm:$0xff]  ;;  %v7665_v17 = vld [vmem:[%s7520_s10 + $0xb0] sm:$0xff]  ;;  %v7668_v18 = vld [vmem:[%s7520_s10 + $0x99] sm:$0xff] }
  0x45   : > { %6370 = vmatmul.mubr.msk.f32.vlgmr.msra.gmra.mrb[0].mxu0 %vm501_vm4, %v459_v55  ;;  %6346 = vmatprep.mubr.msk.f32.mxu1 %vm501_vm4, %v7594_v4  ;;  %v7671_v19 = vld [vmem:[%s7520_s10 + $0xc0] sm:$0xff]  ;;  %v7674_v20 = vld [vmem:[%s7520_s10 + $0xa9] sm:$0xff]  ;;  %v7688_v22 = vld [vmem:[%s7520_s10 + $0xb1] sm:$0xff] }
  0x46   : > { %6400 = vmatpush3.msk.msra.mxu0 %vm562_vm3, %v5512_v54  ;;  %6372 = vmatprep.mubr.msk.f32.mxu0 %vm501_vm4, %v7536_v56  ;;  %v7685_v21 = vld [vmem:[%s7520_s10 + $0xc8] sm:$0xff]  ;;  %v7691_v23 = vld [vmem:[%s7520_s10 + $0xd8] sm:$0xff]  ;;  %v7705_v25 = vld [vmem:[%s7520_s10 + $0xe0] sm:$0xff] }
  0x47   : > { %6431 = vmatprep.subr.msk.mxu0 %vm562_vm3, %v7541_v57  ;;  %v7694_v24 = vld [vmem:[%s7520_s10 + $0xc1] sm:$0xff]  ;;  %v7708_v26 = vld [vmem:[%s7520_s10 + $0xc9] sm:$0xff]  ;;  %v7712_v28 = vld [vmem:[%s7520_s10 + $0xd9] sm:$0xff] }
  0x48   : > { %6347 = vmatmul.mubr.msk.f32.gmra.mrb[4].mxu1 %vm501_vm4, %v7608_v6  ;;  %v959_v27 = vld [vmem:[%s7520_s10 + $0x2] sm:$0xff]  ;;  %v960_v29 = vld [vmem:[%s7520_s10 + $0xa] sm:$0xff]  ;;  %v7726_v31 = vld [vmem:[%s7520_s10 + $0x1a] sm:$0xff] }
  0x49   : > { %6373 = vmatmul.mubr.msk.f32.gmra.mrb[2].mxu0 %vm501_vm4, %v7548_v58  ;;  %6349 = vmatprep.mubr.msk.f32.mxu1 %vm501_vm4, %v7614_v8  ;;  %v7723_v30 = vld [vmem:[%s7520_s10 + $0xe1] sm:$0xff]  ;;  %v7742_v34 = vld [vmem:[%s7520_s10 + $0x32] sm:$0xff]  ;;  %v7753_v36 = vld [vmem:[%s7520_s10 + $0x4a] sm:$0xff] }
  0x4a   : > { %6375 = vmatprep.mubr.msk.f32.mxu0 %vm501_vm4, %v7551_v59  ;;  %v7739_v33 = vld [vmem:[%s7520_s10 + $0x22] sm:$0xff]  ;;  %v7750_v35 = vld [vmem:[%s7520_s10 + $0x3a] sm:$0xff]  ;;  %v7760_v37 = vld [vmem:[%s7520_s10 + $0x52] sm:$0xff] }
  0x4b   : > { %v7763_v38 = vld [vmem:[%s7520_s10 + $0x62] sm:$0xff]  ;;  %v7770_v39 = vld [vmem:[%s7520_s10 + $0x6a] sm:$0xff]  ;;  %v7773_v40 = vld [vmem:[%s7520_s10 + $0x7a] sm:$0xff] }
  0x4c   : > { %6350 = vmatmul.mubr.msk.f32.gmra.mrb[6].mxu1 %vm501_vm4, %v7628_v10  ;;  %v7780_v41 = vld [vmem:[%s7520_s10 + $0x82] sm:$0xff]  ;;  %v7783_v42 = vld [vmem:[%s7520_s10 + $0x92] sm:$0xff]  ;;  %v7790_v43 = vld [vmem:[%s7520_s10 + $0x9a] sm:$0xff] }
  0x4d   : > { %6376 = vmatmul.mubr.msk.f32.gmra.mrb[4].mxu0 %vm501_vm4, %v7563_v61  ;;  %6352 = vmatprep.mubr.msk.f32.mxu1 %vm501_vm4, %v7634_v12  ;;  %v7793_v44 = vld [vmem:[%s7520_s10 + $0xaa] sm:$0xff]  ;;  %v7800_v45 = vld [vmem:[%s7520_s10 + $0xb2] sm:$0xff]  ;;  %v7803_v46 = vld [vmem:[%s7520_s10 + $0xc2] sm:$0xff] }
  0x4e   : > { %6378 = vmatprep.mubr.msk.f32.mxu0 %vm501_vm4, %v7571_v63  ;;  %v7810_v47 = vld [vmem:[%s7520_s10 + $0xca] sm:$0xff]  ;;  %v7813_v48 = vld [vmem:[%s7520_s10 + $0xda] sm:$0xff]  ;;  %v7820_v49 = vld [vmem:[%s7520_s10 + $0xe2] sm:$0xff] }
  0x4f   : > { %v5640_v50 = vld [vmem:[%s9002_s1 + $0x14] sm:$0xf]  ;;  %v7871_v52 = vld [vmem:[%s7520_s10 + $0xf8] sm:$0xff] }
  0x50   : > { %6353 = vmatmul.mubr.msk.f32.gmra.mrb[8].mxu1 %vm501_vm4, %v7648_v14  ;;  %v7864_v51 = vld [vmem:[%s7520_s10 + $0xf0] sm:$0xff]  ;;  %v5684_v53 = vld [vmem:[%s9002_s1 + $0x18] sm:$0xf] }
  0x51   : > { %6379 = vmatmul.mubr.msk.f32.gmra.mrb[6].mxu0 %vm501_vm4, %v7585_v1  ;;  %6355 = vmatprep.mubr.msk.f32.mxu1 %vm501_vm4, %v7654_v16  ;;  %v7915_v54 = vld [vmem:[%s7520_s10 + $0xf1] sm:$0xff]  ;;  %v7922_v55 = vld [vmem:[%s7520_s10 + $0xf9] sm:$0xff] }
  0x52   : > { %6381 = vmatprep.mubr.msk.f32.mxu0 %vm501_vm4, %v7591_v3 }
  0x54   : > { %6356 = vmatmul.mubr.msk.f32.gmra.mrb[10].mxu1 %vm501_vm4, %v7668_v18 }
  0x55   : > { %6382 = vmatmul.mubr.msk.f32.gmra.mrb[8].mxu0 %vm501_vm4, %v7605_v5  ;;  %6358 = vmatprep.mubr.msk.f32.mxu1 %vm501_vm4, %v7674_v20 }
  0x56   : > { %6384 = vmatprep.mubr.msk.f32.mxu0 %vm501_vm4, %v7611_v7 }
  0x58   : > { %6359 = vmatmul.mubr.msk.f32.gmra.mrb[12].mxu1 %vm501_vm4, %v7688_v22 }
  0x59   : > { %6385 = vmatmul.mubr.msk.f32.gmra.mrb[10].mxu0 %vm501_vm4, %v7625_v9  ;;  %6361 = vmatprep.mubr.msk.f32.mxu1 %vm501_vm4, %v7694_v24 }
  0x5a   : > { %6387 = vmatprep.mubr.msk.f32.mxu0 %vm501_vm4, %v7631_v11 }
  0x5c   : > { %6362 = vmatmul.mubr.msk.f32.gmra.mrb[14].mxu1 %vm501_vm4, %v7708_v26 }
  0x5d   : > { %6388 = vmatmul.mubr.msk.f32.gmra.mrb[12].mxu0 %vm501_vm4, %v7645_v13  ;;  %6364 = vmatprep.mubr.msk.f32.mxu1 %vm501_vm4, %v7712_v28 }
  0x5e   : > { %6390 = vmatprep.mubr.msk.f32.mxu0 %vm501_vm4, %v7651_v15 }
  0x60   : > { %6365 = vmatmul.mubr.msk.f32.gmra.mrb[16].mxu1 %vm501_vm4, %v7723_v30 }
  0x61   : > { %6391 = vmatmul.mubr.msk.f32.gmra.mrb[14].mxu0 %vm501_vm4, %v7665_v17 }
  0x62   : > { %6393 = vmatprep.mubr.msk.f32.mxu0 %vm501_vm4, %v7671_v19 }
  0x65   : > { %6394 = vmatmul.mubr.msk.f32.gmra.mrb[16].mxu0 %vm501_vm4, %v7685_v21 }
  0x66   : > { %6396 = vmatprep.mubr.msk.f32.mxu0 %vm501_vm4, %v7691_v23 }
  0x69   : > { %6397 = vmatmul.mubr.msk.f32.gmra.mrb[18].mxu0 %vm501_vm4, %v7705_v25 }
  0x6a   : > { %6401 = vmatprep.mubr.msk.f32.mxu0 %vm501_vm4, %v959_v27 }
  0x6d   : > { %6402 = vmatmul.mubr.msk.f32.vlgmr.msra.gmra.mrb[0].mxu0 %vm501_vm4, %v960_v29 }
  0x6e   : > { %6432 = vmatpush3.msk.msra.mxu0 %vm562_vm3, %v7541_v57  ;;  %6404 = vmatprep.mubr.msk.f32.mxu0 %vm501_vm4, %v7726_v31  ;;  %v5811_v57 = vld [vmem:[%s9003_s2 + $0x4] sm:$0xf] }
  0x6f   : > { %6463 = vmatprep.subr.msk.mxu0 %vm562_vm3, %v5598_v32  ;;  %6623 = vmatprep.subr.msk.mxu1 %vm562_vm3, %v5811_v57 }
  0x70   : > { %6624 = vmatpush3.msk.msra.mxu1 %vm562_vm3, %v5811_v57 }
  0x71   : > { %6405 = vmatmul.mubr.msk.f32.gmra.mrb[2].mxu0 %vm501_vm4, %v7739_v33 }
  0x72   : > { %6407 = vmatprep.mubr.msk.f32.mxu0 %vm501_vm4, %v7742_v34 }
  0x75   : > { %6408 = vmatmul.mubr.msk.f32.gmra.mrb[4].mxu0 %vm501_vm4, %v7750_v35 }
  0x76   : > { %6410 = vmatprep.mubr.msk.f32.mxu0 %vm501_vm4, %v7753_v36 }
  0x79   : > { %6411 = vmatmul.mubr.msk.f32.gmra.mrb[6].mxu0 %vm501_vm4, %v7760_v37 }
  0x7a   : > { %6413 = vmatprep.mubr.msk.f32.mxu0 %vm501_vm4, %v7763_v38 }
  0x7d   : > { %6414 = vmatmul.mubr.msk.f32.gmra.mrb[8].mxu0 %vm501_vm4, %v7770_v39 }
  0x7e   : > { %6416 = vmatprep.mubr.msk.f32.mxu0 %vm501_vm4, %v7773_v40 }
  0x81   : > { %6417 = vmatmul.mubr.msk.f32.gmra.mrb[10].mxu0 %vm501_vm4, %v7780_v41 }
  0x82   : > { %6419 = vmatprep.mubr.msk.f32.mxu0 %vm501_vm4, %v7783_v42 }
  0x85   : > { %6420 = vmatmul.mubr.msk.f32.gmra.mrb[12].mxu0 %vm501_vm4, %v7790_v43 }
  0x86   : > { %6422 = vmatprep.mubr.msk.f32.mxu0 %vm501_vm4, %v7793_v44 }
  0x89   : > { %6423 = vmatmul.mubr.msk.f32.gmra.mrb[14].mxu0 %vm501_vm4, %v7800_v45 }
  0x8a   : > { %6425 = vmatprep.mubr.msk.f32.mxu0 %vm501_vm4, %v7803_v46 }
  0x8d   : > { %6426 = vmatmul.mubr.msk.f32.gmra.mrb[16].mxu0 %vm501_vm4, %v7810_v47 }
  0x8e   : > { %6428 = vmatprep.mubr.msk.f32.mxu0 %vm501_vm4, %v7813_v48 }
  0x91   : > { %6429 = vmatmul.mubr.msk.f32.gmra.mrb[18].mxu0 %vm501_vm4, %v7820_v49 }
  0x92   : > { %6433 = vmatprep.mubr.msk.f32.mxu0 %vm501_vm4, %v7536_v56  ;;  %v5726_v56 = vld [vmem:[%s9002_s1 + $0x1c] sm:$0xf] }
  0x95   : > { %6434 = vmatmul.mubr.msk.f32.vlgmr.msra.gmra.mrb[0].mxu0 %vm501_vm4, %v7548_v58  ;;  %v7970_v58 = vld [vmem:[%s7520_s10 + $0xf2] sm:$0xff] }
  0x96   : > { %6464 = vmatpush3.msk.msra.mxu0 %vm562_vm3, %v5598_v32  ;;  %6436 = vmatprep.mubr.msk.f32.mxu0 %vm501_vm4, %v7551_v59  ;;  %v8150_v32 = vstv %s5810_s11 }
  0x97   : > { %6495 = vmatprep.subr.msk.mxu0 %vm562_vm3, %v5640_v50  ;;  %vm2986_vm5 = vcmp.ge.s32.totalorder %v8150_v32, 0  ;;  %vm2996_vm6 = vcmp.lt.s32.totalorder %v8150_v32, 16  ;;  %v8190_v57 = vadd.s32 7, %v8150_v32 }
  0x98   : > { %vm8197_vm14 = vmand %vm2986_vm5, %vm2996_vm6 }
  0x99   : > { %6437 = vmatmul.mubr.msk.f32.gmra.mrb[2].mxu0 %vm501_vm4, %v7563_v61 }
  0x9a   : > { %6439 = vmatprep.mubr.msk.f32.mxu0 %vm501_vm4, %v7571_v63 }
  0x9d   : > { %6440 = vmatmul.mubr.msk.f32.gmra.mrb[4].mxu0 %vm501_vm4, %v7585_v1 }
  0x9e   : > { %6442 = vmatprep.mubr.msk.f32.mxu0 %vm501_vm4, %v7591_v3 }
  0xa1   : > { %6443 = vmatmul.mubr.msk.f32.gmra.mrb[6].mxu0 %vm501_vm4, %v7605_v5 }
  0xa2   : > { %6445 = vmatprep.mubr.msk.f32.mxu0 %vm501_vm4, %v7611_v7 }
  0xa5   : > { %6446 = vmatmul.mubr.msk.f32.gmra.mrb[8].mxu0 %vm501_vm4, %v7625_v9 }
  0xa6   : > { %6448 = vmatprep.mubr.msk.f32.mxu0 %vm501_vm4, %v7631_v11 }
  0xa9   : > { %6449 = vmatmul.mubr.msk.f32.gmra.mrb[10].mxu0 %vm501_vm4, %v7645_v13 }
  0xaa   : > { %6451 = vmatprep.mubr.msk.f32.mxu0 %vm501_vm4, %v7651_v15 }
  0xad   : > { %6452 = vmatmul.mubr.msk.f32.gmra.mrb[12].mxu0 %vm501_vm4, %v7665_v17 }
  0xae   : > { %6454 = vmatprep.mubr.msk.f32.mxu0 %vm501_vm4, %v7671_v19 }
  0xb1   : > { %6455 = vmatmul.mubr.msk.f32.gmra.mrb[14].mxu0 %vm501_vm4, %v7685_v21 }
  0xb2   : > { %6457 = vmatprep.mubr.msk.f32.mxu0 %vm501_vm4, %v7691_v23 }
  0xb5   : > { %6458 = vmatmul.mubr.msk.f32.gmra.mrb[16].mxu0 %vm501_vm4, %v7705_v25 }
  0xb6   : > { %6460 = vmatprep.mubr.msk.f32.mxu0 %vm501_vm4, %v7864_v51 }
  0xb9   : > { %6461 = vmatmul.mubr.msk.f32.gmra.mrb[18].mxu0 %vm501_vm4, %v7871_v52 }
  0xba   : > { %6465 = vmatprep.mubr.msk.f32.mxu0 %vm501_vm4, %v7558_v60  ;;  %v7978_v60 = vld [vmem:[%s7520_s10 + $0xfa] sm:$0xff] }
  0xbd   : > { %6466 = vmatmul.mubr.msk.f32.vlgmr.msra.gmra.mrb[0].mxu0 %vm501_vm4, %v7566_v62  ;;  %v5768_v62 = vld [vmem:[%s9002_s1 + $0x20] sm:$0xf] }
  0xbe   : > { %6496 = vmatpush3.msk.msra.mxu0 %vm562_vm3, %v5640_v50  ;;  %6468 = vmatprep.mubr.msk.f32.mxu0 %vm501_vm4, %v7574_v0 }
  0xbf   : > { %6527 = vmatprep.subr.msk.mxu0 %vm562_vm3, %v5684_v53 }
  0xc1   : > { %6469 = vmatmul.mubr.msk.f32.gmra.mrb[2].mxu0 %vm501_vm4, %v7588_v2 }
  0xc2   : > { %6471 = vmatprep.mubr.msk.f32.mxu0 %vm501_vm4, %v7594_v4 }
  0xc5   : > { %6472 = vmatmul.mubr.msk.f32.gmra.mrb[4].mxu0 %vm501_vm4, %v7608_v6 }
  0xc6   : > { %6474 = vmatprep.mubr.msk.f32.mxu0 %vm501_vm4, %v7614_v8 }
  0xc9   : > { %6475 = vmatmul.mubr.msk.f32.gmra.mrb[6].mxu0 %vm501_vm4, %v7628_v10 }
  0xca   : > { %6477 = vmatprep.mubr.msk.f32.mxu0 %vm501_vm4, %v7634_v12 }
  0xcd   : > { %6478 = vmatmul.mubr.msk.f32.gmra.mrb[8].mxu0 %vm501_vm4, %v7648_v14 }
  0xce   : > { %6480 = vmatprep.mubr.msk.f32.mxu0 %vm501_vm4, %v7654_v16 }
  0xd1   : > { %6481 = vmatmul.mubr.msk.f32.gmra.mrb[10].mxu0 %vm501_vm4, %v7668_v18 }
  0xd2   : > { %6483 = vmatprep.mubr.msk.f32.mxu0 %vm501_vm4, %v7674_v20 }
  0xd5   : > { %6484 = vmatmul.mubr.msk.f32.gmra.mrb[12].mxu0 %vm501_vm4, %v7688_v22 }
  0xd6   : > { %6486 = vmatprep.mubr.msk.f32.mxu0 %vm501_vm4, %v7694_v24 }
  0xd9   : > { %6487 = vmatmul.mubr.msk.f32.gmra.mrb[14].mxu0 %vm501_vm4, %v7708_v26 }
  0xda   : > { %6489 = vmatprep.mubr.msk.f32.mxu0 %vm501_vm4, %v7712_v28 }
  0xdd   : > { %6490 = vmatmul.mubr.msk.f32.gmra.mrb[16].mxu0 %vm501_vm4, %v7723_v30 }
  0xde   : > { %6492 = vmatprep.mubr.msk.f32.mxu0 %vm501_vm4, %v7915_v54 }
  0xe1   : > { %6493 = vmatmul.mubr.msk.f32.gmra.mrb[18].mxu0 %vm501_vm4, %v7922_v55 }
  0xe2   : > { %6497 = vmatprep.mubr.msk.f32.mxu0 %vm501_vm4, %v7726_v31 }
  0xe5   : > { %6498 = vmatmul.mubr.msk.f32.vlgmr.msra.gmra.mrb[0].mxu0 %vm501_vm4, %v7739_v33 }
  0xe6   : > { %6528 = vmatpush3.msk.msra.mxu0 %vm562_vm3, %v5684_v53  ;;  %6500 = vmatprep.mubr.msk.f32.mxu0 %vm501_vm4, %v7742_v34  ;;  %v8181_v53 = vadd.s32 5, %v8150_v32 }
  0xe7   : > { %6559 = vmatprep.subr.msk.mxu0 %vm562_vm3, %v5726_v56 }
  0xe9   : > { %6501 = vmatmul.mubr.msk.f32.gmra.mrb[2].mxu0 %vm501_vm4, %v7750_v35 }
  0xea   : > { %6503 = vmatprep.mubr.msk.f32.mxu0 %vm501_vm4, %v7753_v36 }
  0xed   : > { %6504 = vmatmul.mubr.msk.f32.gmra.mrb[4].mxu0 %vm501_vm4, %v7760_v37 }
  0xee   : > { %6506 = vmatprep.mubr.msk.f32.mxu0 %vm501_vm4, %v7763_v38 }
  0xf1   : > { %6507 = vmatmul.mubr.msk.f32.gmra.mrb[6].mxu0 %vm501_vm4, %v7770_v39 }
  0xf2   : > { %6509 = vmatprep.mubr.msk.f32.mxu0 %vm501_vm4, %v7773_v40 }
  0xf5   : > { %6510 = vmatmul.mubr.msk.f32.gmra.mrb[8].mxu0 %vm501_vm4, %v7780_v41 }
  0xf6   : > { %6512 = vmatprep.mubr.msk.f32.mxu0 %vm501_vm4, %v7783_v42 }
  0xf9   : > { %6513 = vmatmul.mubr.msk.f32.gmra.mrb[10].mxu0 %vm501_vm4, %v7790_v43 }
  0xfa   : > { %6515 = vmatprep.mubr.msk.f32.mxu0 %vm501_vm4, %v7793_v44 }
  0xfd   : > { %6516 = vmatmul.mubr.msk.f32.gmra.mrb[12].mxu0 %vm501_vm4, %v7800_v45 }
  0xfe   : > { %6518 = vmatprep.mubr.msk.f32.mxu0 %vm501_vm4, %v7803_v46 }
 0x101   : > { %6519 = vmatmul.mubr.msk.f32.gmra.mrb[14].mxu0 %vm501_vm4, %v7810_v47 }
 0x102   : > { %6521 = vmatprep.mubr.msk.f32.mxu0 %vm501_vm4, %v7813_v48 }
 0x105   : > { %6522 = vmatmul.mubr.msk.f32.gmra.mrb[16].mxu0 %vm501_vm4, %v7820_v49 }
 0x106   : > { %6524 = vmatprep.mubr.msk.f32.mxu0 %vm501_vm4, %v7970_v58 }
 0x109   : > { %6525 = vmatmul.mubr.msk.f32.gmra.mrb[18].mxu0 %vm501_vm4, %v7978_v60 }
 0x10a   : > { %6529 = vmatprep.mubr.msk.f32.mxu0 %vm501_vm4, %v7551_v59  ;;  %v5682_v59 = vld [vmem:[%s7520_s10 + $0x108] sm:$0xff] }
 0x10d   : > { %6530 = vmatmul.mubr.msk.f32.vlgmr.msra.gmra.mrb[0].mxu0 %vm501_vm4, %v7563_v61  ;;  %v5683_v61 = vld [vmem:[%s7520_s10 + $0x110] sm:$0xff] }
 0x10e   : > { %6560 = vmatpush3.msk.msra.mxu0 %vm562_vm3, %v5726_v56  ;;  %6532 = vmatprep.mubr.msk.f32.mxu0 %vm501_vm4, %v7571_v63  ;;  %v5724_v63 = vld [vmem:[%s7520_s10 + $0x109] sm:$0xff]  ;;  %v8187_v56 = vadd.s32 6, %v8150_v32 }
 0x10f   : > { %6591 = vmatprep.subr.msk.mxu0 %vm562_vm3, %v5768_v62 }
 0x111   : > { %6533 = vmatmul.mubr.msk.f32.gmra.mrb[2].mxu0 %vm501_vm4, %v7585_v1  ;;  %v5766_v1 = vld [vmem:[%s7520_s10 + $0x10a] sm:$0xff] }
 0x112   : > { %6535 = vmatprep.mubr.msk.f32.mxu0 %vm501_vm4, %v7591_v3 }
 0x113   : > { %v6342_v3 = vpop.f32.mrb[0].mxu1 }
 0x115   : > { %6536 = vmatmul.mubr.msk.f32.gmra.mrb[4].mxu0 %vm501_vm4, %v7605_v5 }
 0x116   : > { %6538 = vmatprep.mubr.msk.f32.mxu0 %vm501_vm4, %v7611_v7 }
 0x119   : > { %6539 = vmatmul.mubr.msk.f32.gmra.mrb[6].mxu0 %vm501_vm4, %v7625_v9 }
 0x11a   : > { %6541 = vmatprep.mubr.msk.f32.mxu0 %vm501_vm4, %v7631_v11 }
 0x11d   : > { %6542 = vmatmul.mubr.msk.f32.gmra.mrb[8].mxu0 %vm501_vm4, %v7645_v13 }
 0x11e   : > { %6544 = vmatprep.mubr.msk.f32.mxu0 %vm501_vm4, %v7651_v15 }
 0x121   : > { %6545 = vmatmul.mubr.msk.f32.gmra.mrb[10].mxu0 %vm501_vm4, %v7665_v17 }
 0x122   : > { %6547 = vmatprep.mubr.msk.f32.mxu0 %vm501_vm4, %v7671_v19 }
 0x125   : > { %6548 = vmatmul.mubr.msk.f32.gmra.mrb[12].mxu0 %vm501_vm4, %v7685_v21  ;;  %v8135_v21 = vld [vmem:[%s9003_s2] sm:$0xf] }
 0x126   : > { %6550 = vmatprep.mubr.msk.f32.mxu0 %vm501_vm4, %v7691_v23  ;;  %6649 = vmatprep.subr.msk.mxu1 %vm562_vm3, %v8135_v21 }
 0x129   : > { %6551 = vmatmul.mubr.msk.f32.gmra.mrb[14].mxu0 %vm501_vm4, %v7705_v25 }
 0x12a   : > { %6553 = vmatprep.mubr.msk.f32.mxu0 %vm501_vm4, %v7864_v51 }
 0x12d   : > { %6554 = vmatmul.mubr.msk.f32.gmra.mrb[16].mxu0 %vm501_vm4, %v7871_v52  ;;  %v8178_v52 = vadd.s32 4, %v8150_v32 }
 0x12e   : > { %6556 = vmatprep.mubr.msk.f32.mxu0 %vm501_vm4, %v5682_v59 }
 0x131   : > { %6557 = vmatmul.mubr.msk.f32.gmra.mrb[18].mxu0 %vm501_vm4, %v5683_v61 }
 0x132   : > { %6561 = vmatprep.mubr.msk.f32.mxu0 %vm501_vm4, %v7574_v0  ;;  %v5725_v0 = vld [vmem:[%s7520_s10 + $0x111] sm:$0xff] }
 0x135   : > { %6562 = vmatmul.mubr.msk.f32.vlgmr.msra.gmra.mrb[0].mxu0 %vm501_vm4, %v7588_v2  ;;  %v5767_v2 = vld [vmem:[%s7520_s10 + $0x112] sm:$0xff] }
 0x136   : > { %6592 = vmatpush3.msk.msra.mxu0 %vm562_vm3, %v5768_v62  ;;  %6564 = vmatprep.mubr.msk.f32.mxu0 %vm501_vm4, %v7594_v4  ;;  %v642_v4 = vpop.f32.mrb[1].mxu1 }
 0x137   : > { %v6345_v5 = vpop.f32.mrb[2].mxu1 }
 0x139   : > { %6565 = vmatmul.mubr.msk.f32.gmra.mrb[2].mxu0 %vm501_vm4, %v7608_v6  ;;  %v652_v6 = vpop.f32.mrb[3].mxu1 }
 0x13a   : > { %6567 = vmatprep.mubr.msk.f32.mxu0 %vm501_vm4, %v7614_v8  ;;  %v6348_v7 = vpop.f32.mrb[4].mxu1 }
 0x13b   : > { %v662_v8 = vpop.f32.mrb[5].mxu1 }
 0x13c   : > { %v8108_v9 = vpop.f32.mrb[6].mxu1 }
 0x13d   : > { %6568 = vmatmul.mubr.msk.f32.gmra.mrb[4].mxu0 %vm501_vm4, %v7628_v10  ;;  %v8110_v10 = vpop.f32.mrb[7].mxu1 }
 0x13e   : > { %6570 = vmatprep.mubr.msk.f32.mxu0 %vm501_vm4, %v7634_v12  ;;  %v8112_v11 = vpop.f32.mrb[8].mxu1 }
 0x13f   : > { %v8114_v12 = vpop.f32.mrb[9].mxu1 }
 0x140   : > { %v8116_v13 = vpop.f32.mrb[10].mxu1 }
 0x141   : > { %6571 = vmatmul.mubr.msk.f32.gmra.mrb[6].mxu0 %vm501_vm4, %v7648_v14  ;;  %v8118_v14 = vpop.f32.mrb[11].mxu1 }
 0x142   : > { %6573 = vmatprep.mubr.msk.f32.mxu0 %vm501_vm4, %v7654_v16  ;;  %v8120_v15 = vpop.f32.mrb[12].mxu1 }
 0x143   : > { %v8122_v16 = vpop.f32.mrb[13].mxu1 }
 0x144   : > { %v8124_v17 = vpop.f32.mrb[14].mxu1 }
 0x145   : > { %6574 = vmatmul.mubr.msk.f32.gmra.mrb[8].mxu0 %vm501_vm4, %v7668_v18  ;;  %v8126_v18 = vpop.f32.mrb[15].mxu1 }
 0x146   : > { %6576 = vmatprep.mubr.msk.f32.mxu0 %vm501_vm4, %v7674_v20  ;;  %v8128_v19 = vpop.f32.mrb[16].mxu1 }
 0x147   : > { %v8130_v20 = vpop.f32.mrb[17].mxu1 }
 0x149   : > { %6577 = vmatmul.mubr.msk.f32.gmra.mrb[10].mxu0 %vm501_vm4, %v7688_v22 }
 0x14a   : > { %6579 = vmatprep.mubr.msk.f32.mxu0 %vm501_vm4, %v7694_v24 }
 0x14d   : > { %6580 = vmatmul.mubr.msk.f32.gmra.mrb[12].mxu0 %vm501_vm4, %v7708_v26 }
 0x14e   : > { %6582 = vmatprep.mubr.msk.f32.mxu0 %vm501_vm4, %v7712_v28 }
 0x151   : > { %6583 = vmatmul.mubr.msk.f32.gmra.mrb[14].mxu0 %vm501_vm4, %v7723_v30 }
 0x152   : > { %6585 = vmatprep.mubr.msk.f32.mxu0 %vm501_vm4, %v7915_v54 }
 0x155   : > { %6586 = vmatmul.mubr.msk.f32.gmra.mrb[16].mxu0 %vm501_vm4, %v7922_v55 }
 0x156   : > { %6588 = vmatprep.mubr.msk.f32.mxu0 %vm501_vm4, %v5724_v63 }
 0x159   : > { %6589 = vmatmul.mubr.msk.f32.gmra.mrb[18].mxu0 %vm501_vm4, %v5725_v0 }
 0x15a   : > { %6593 = vmatprep.mubr.msk.f32.mxu0 %vm501_vm4, %v7742_v34  ;;  %v8154_v34 = vadd.s32 1, %v8150_v32 }
 0x15c   : > { %vm2987_vm9 = vcmp.ge.s32.totalorder %v8154_v34, 0  ;;  %vm2997_vm10 = vcmp.lt.s32.totalorder %v8154_v34, 16 }
 0x15d   : > { %6594 = vmatmul.mubr.msk.f32.vlgmr.msra.gmra.mrb[0].mxu0 %vm501_vm4, %v7750_v35 }
 0x15e   : > { %6596 = vmatprep.mubr.msk.f32.mxu0 %vm501_vm4, %v7753_v36 }
 0x161   : > { %6597 = vmatmul.mubr.msk.f32.gmra.mrb[2].mxu0 %vm501_vm4, %v7760_v37 }
 0x162   : > { %6599 = vmatprep.mubr.msk.f32.mxu0 %vm501_vm4, %v7763_v38 }
 0x165   : > { %6600 = vmatmul.mubr.msk.f32.gmra.mrb[4].mxu0 %vm501_vm4, %v7770_v39 }
 0x166   : > { %6602 = vmatprep.mubr.msk.f32.mxu0 %vm501_vm4, %v7773_v40 }
 0x169   : > { %6603 = vmatmul.mubr.msk.f32.gmra.mrb[6].mxu0 %vm501_vm4, %v7780_v41 }
 0x16a   : > { %6605 = vmatprep.mubr.msk.f32.mxu0 %vm501_vm4, %v7783_v42 }
 0x16d   : > { %6606 = vmatmul.mubr.msk.f32.gmra.mrb[8].mxu0 %vm501_vm4, %v7790_v43  ;;  %v8165_v43 = vadd.s32 2, %v8150_v32 }
 0x16e   : > { %6608 = vmatprep.mubr.msk.f32.mxu0 %vm501_vm4, %v7793_v44 }
 0x16f   : > { %vm2988_vm11 = vcmp.ge.s32.totalorder %v8165_v43, 0  ;;  %vm2998_vm12 = vcmp.lt.s32.totalorder %v8165_v43, 16 }
 0x171   : > { %6609 = vmatmul.mubr.msk.f32.gmra.mrb[10].mxu0 %vm501_vm4, %v7800_v45 }
 0x172   : > { %6611 = vmatprep.mubr.msk.f32.mxu0 %vm501_vm4, %v7803_v46 }
 0x175   : > { %6612 = vmatmul.mubr.msk.f32.gmra.mrb[12].mxu0 %vm501_vm4, %v7810_v47 }
 0x176   : > { %6614 = vmatprep.mubr.msk.f32.mxu0 %vm501_vm4, %v7813_v48  ;;  %v8173_v48 = vadd.s32 3, %v8150_v32 }
 0x178   : > { %vm2989_vm1 = vcmp.ge.s32.totalorder %v8173_v48, 0  ;;  %vm2999_vm2 = vcmp.lt.s32.totalorder %v8173_v48, 16 }
 0x179   : > { %6615 = vmatmul.mubr.msk.f32.gmra.mrb[14].mxu0 %vm501_vm4, %v7820_v49 }
 0x17a   : > { %6617 = vmatprep.mubr.msk.f32.mxu0 %vm501_vm4, %v7970_v58 }
 0x17d   : > { %6618 = vmatmul.mubr.msk.f32.gmra.mrb[16].mxu0 %vm501_vm4, %v7978_v60 }
 0x17e   : > { %6620 = vmatprep.mubr.msk.f32.mxu0 %vm501_vm4, %v5766_v1 }
 0x181   : > { %6621 = vmatmul.mubr.msk.f32.gmra.mrb[18].mxu0 %vm501_vm4, %v5767_v2 }
 0x230   : > { %v8139_v22 = vpop.f32.mrb[0].mxu0 }
 0x231   : > { %v2856_v23 = vmin.f32 %v8139_v22, 0.0  ;;  %v8142_v24 = vpop.f32.mrb[1].mxu0  ;;  %vm2876_vm13 = vcmp.gt.f32.partialorder %v8139_v22, 0.0 }
 0x232   : > { %v2855_v25 = vmin.f32 %v8142_v24, 0.0  ;;  %vm2875_vm15 = vcmp.gt.f32.partialorder %v8142_v24, 0.0 }
 0x233   : > { %v2897_v26 = vmul.f32 1.442695, %v2856_v23 }
 0x234   : > { %v2895_v27 = vmul.f32 1.442695, %v2855_v25  ;;  %v6598_v28 = vpop.f32.mrb[2].mxu0 }
 0x235   : > { %7188 = vpow2.f32 %v2897_v26  ;;  %v8146_v29 = vadd.f32 %v6598_v28, %v6342_v3  ;;  %v2746_v30 = vpop.f32.mrb[3].mxu0 }
 0x236   : > { %7190 = vpow2.f32 %v2895_v27  ;;  %v8148_v31 = vadd.f32 %v2746_v30, %v642_v4 }
 0x237   : > { %v2858_v33 = vmin.f32 %v8146_v29, 0.0  ;;  %vm2878_vm0 = vcmp.gt.f32.partialorder %v8146_v29, 0.0 }
 0x238   : > { %v2857_v35 = vmin.f32 %v8148_v31, 0.0  ;;  %v6601_v36 = vpop.f32.mrb[4].mxu0  ;;  %vm2877_vm5 = vcmp.gt.f32.partialorder %v8148_v31, 0.0 }
 0x239   : > { %v2901_v37 = vmul.f32 1.442695, %v2858_v33  ;;  %v8157_v38 = vadd.f32 %v6601_v36, %v6345_v5  ;;  %v2756_v39 = vpop.f32.mrb[5].mxu0 }
 0x23a   : > { %v2899_v40 = vmul.f32 1.442695, %v2857_v35  ;;  %v8161_v41 = vadd.f32 %v2756_v39, %v652_v6 }
 0x23b   : > { %7192 = vpow2.f32 %v2901_v37  ;;  %v2860_v42 = vmin.f32 %v8157_v38, 0.0  ;;  %vm2880_vm6 = vcmp.gt.f32.partialorder %v8157_v38, 0.0 }
 0x23c   : > { %7194 = vpow2.f32 %v2899_v40  ;;  %v2859_v44 = vmin.f32 %v8161_v41, 0.0  ;;  %v6604_v45 = vpop.f32.mrb[6].mxu0 }
 0x23d   : > { %v2905_v46 = vmul.f32 1.442695, %v2860_v42  ;;  %v8170_v47 = vadd.f32 %v6604_v45, %v6348_v7  ;;  %v2766_v49 = vpop.f32.mrb[7].mxu0 }
 0x23e   : > { %v2903_v50 = vmul.f32 1.442695, %v2859_v44  ;;  %v8175_v51 = vadd.f32 %v2766_v49, %v662_v8 }
 0x23f   : > { %v7189_v54 = vpop.eup %7188  ;;  %7196 = vpow2.f32 %v2905_v46  ;;  %v2862_v55 = vmin.f32 %v8170_v47, 0.0 }
 0x240   : > { %v7191_v58 = vpop.eup %7190  ;;  %v5791_v60 = vadd.f32 -1.0, %v7189_v54  ;;  %7198 = vpow2.f32 %v2903_v50  ;;  %v2861_v59 = vmin.f32 %v8175_v51, 0.0  ;;  %v6607_v61 = vpop.f32.mrb[8].mxu0 }
 0x241   : > { %v5790_v63 = vadd.f32 -1.0, %v7191_v58  ;;  %v2909_v0 = vmul.f32 1.442695, %v2862_v55  ;;  %v8204_v1 = vadd.f32 %v6607_v61, %v8108_v9  ;;  %v2776_v2 = vpop.f32.mrb[9].mxu0 }
 0x242   : > { %v2956_v3 = vsel %vm2876_vm13, %v8139_v22, %v5791_v60  ;;  %v2907_v4 = vmul.f32 1.442695, %v2861_v59  ;;  %v8209_v5 = vadd.f32 %v2776_v2, %v8110_v10  ;;  %vm8227_vm13 = vmand %vm2987_vm9, %vm2997_vm10  ;;  %vm3000_vm9 = vcmp.lt.s32.totalorder %v8178_v52, 16 }
 0x243   : > { %v3017_v6 = vsel %vm8197_vm14, %v2956_v3, 0.0  ;;  %v2955_v7 = vsel %vm2875_vm15, %v8142_v24, %v5790_v63  ;;  %7200 = vpow2.f32 %v2909_v0  ;;  %v2864_v8 = vmin.f32 %v8204_v1, 0.0 }
 0x244   : > { %v3058_v9 = vrot.slane %v3017_v6, 7  ;;  %v3016_v22 = vsel %vm8197_vm14, %v2955_v7, 0.0  ;;  %7202 = vpow2.f32 %v2907_v4  ;;  %v6610_v10 = vpop.f32.mrb[10].mxu0  ;;  %v2863_v26 = vmin.f32 %v8209_v5, 0.0 }
 0x245   : > { %v7193_v23 = vpop.eup %7192  ;;  %v3057_v25 = vrot.slane %v3016_v22, 7  ;;  %v2913_v24 = vmul.f32 1.442695, %v2864_v8  ;;  %v2786_v27 = vpop.f32.mrb[11].mxu0  ;;  %v8232_v36 = vadd.f32 %v6610_v10, %v8112_v11  ;;  %vm2990_vm14 = vcmp.ge.s32.totalorder %v8178_v52, 0 }
 0x246   : > { %v7195_v28 = vpop.eup %7194  ;;  %v3127_v30 = vsel %vm3056_vm7, %v3058_v9, 0.0  ;;  %v5793_v33 = vadd.f32 -1.0, %v7193_v23  ;;  %v8235_v37 = vadd.f32 %v2786_v27, %v8114_v12  ;;  %vm2879_vm10 = vcmp.gt.f32.partialorder %v8161_v41, 0.0 }
 0x247   : > { %3140 = vst.msk [vmem:[#allocation3 + $0x10] sm:$0x3] %vm3139_vm8, %v3127_v30  ;;  %v3059_v39 = vsel %vm3056_vm7, %v3057_v25, %v3058_v9  ;;  %v3117_v40 = vsel %vm3056_vm7, 0.0, %v3057_v25  ;;  %v5792_v42 = vadd.f32 -1.0, %v7195_v28  ;;  %7204 = vpow2.f32 %v2913_v24 }
 0x248   : > { %3137 = vst.msk [vmem:[#allocation3] sm:$0xff] %vm501_vm4, %v3117_v40  ;;  %3138 = vst.msk [vmem:[#allocation3 + $0x8] sm:$0xff] %vm501_vm4, %v3059_v39  ;;  %v2958_v11 = vsel %vm2878_vm0, %v8146_v29, %v5793_v33  ;;  %v2911_v12 = vmul.f32 1.442695, %v2863_v26  ;;  %v2866_v34 = vmin.f32 %v8232_v36, 0.0  ;;  %v6613_v44 = vpop.f32.mrb[12].mxu0 }
 0x249   : > { %v7197_v45 = vpop.eup %7196  ;;  %v3019_v46 = vsel %vm8227_vm13, %v2958_v11, 0.0  ;;  %v2957_v49 = vsel %vm2877_vm5, %v8148_v31, %v5792_v42  ;;  %vm2882_vm15 = vcmp.gt.f32.partialorder %v8170_v47, 0.0  ;;  %v2865_v50 = vmin.f32 %v8235_v37, 0.0  ;;  %v2796_v54 = vpop.f32.mrb[13].mxu0  ;;  %vm8262_vm0 = vmand %vm2988_vm11, %vm2998_vm12  ;;  %v8309_v39 = vld [vmem:[%s9003_s2 + $0x8] sm:$0xf] }
 0x24a   : > { %v7199_v29 = vpop.eup %7198  ;;  %v3061_v55 = vrot.slane %v3019_v46, 7  ;;  %v3018_v58 = vsel %vm8227_vm13, %v2957_v49, 0.0  ;;  %v5795_v60 = vadd.f32 -1.0, %v7197_v45  ;;  %7206 = vpow2.f32 %v2911_v12  ;;  %vm8292_vm11 = vmand %vm2989_vm1, %vm2999_vm2 }
 0x24b   : > { %v3060_v31 = vrot.slane %v3018_v58, 7  ;;  %v5794_v59 = vadd.f32 -1.0, %v7199_v29  ;;  %v2917_v61 = vmul.f32 1.442695, %v2866_v34  ;;  %v2915_v63 = vmul.f32 1.442695, %v2865_v50  ;;  %vm8326_vm2 = vmand %vm2990_vm14, %vm3000_vm9 }
 0x24c   : > { %v3128_v0 = vsel %vm3056_vm7, %v3061_v55, 0.0  ;;  %v2960_v2 = vsel %vm2880_vm6, %v8157_v38, %v5795_v60  ;;  %v8271_v3 = vadd.f32 %v6613_v44, %v8116_v13  ;;  %v8274_v43 = vadd.f32 %v2796_v54, %v8118_v14  ;;  %v6616_v4 = vpop.f32.mrb[14].mxu0 }
 0x24d   : > { %v7201_v6 = vpop.eup %7200  ;;  %3143 = vst.msk [vmem:[#allocation3 + $0x28] sm:$0x3] %vm3139_vm8, %v3128_v0  ;;  %v3062_v7 = vsel %vm3056_vm7, %v3060_v31, %v3061_v55  ;;  %v3118_v8 = vsel %vm3056_vm7, 0.0, %v3060_v31  ;;  %v3021_v9 = vsel %vm8262_vm0, %v2960_v2, 0.0  ;;  %v2959_v38 = vsel %vm2879_vm10, %v8161_v41, %v5794_v59  ;;  %v2806_v13 = vpop.f32.mrb[15].mxu0 }
 0x24e   : > { %v7203_v22 = vpop.eup %7202  ;;  %3141 = vst.msk [vmem:[#allocation3 + $0x18] sm:$0xff] %vm501_vm4, %v3118_v8  ;;  %3142 = vst.msk [vmem:[#allocation3 + $0x20] sm:$0xff] %vm501_vm4, %v3062_v7  ;;  %v3064_v14 = vrot.slane %v3021_v9, 7  ;;  %v3020_v10 = vsel %vm8262_vm0, %v2959_v38, 0.0  ;;  %v5797_v23 = vadd.f32 -1.0, %v7201_v6  ;;  %7208 = vpow2.f32 %v2917_v61 }
 0x24f   : > { %vm2991_vm12 = vcmp.ge.s32.totalorder %v8181_v53, 0  ;;  %vm3001_vm5 = vcmp.lt.s32.totalorder %v8181_v53, 16  ;;  %v3063_v41 = vrot.slane %v3020_v10, 7  ;;  %v5796_v24 = vadd.f32 -1.0, %v7203_v22  ;;  %v3185_v27 = vld [vmem:[#allocation3 + $0x1] sm:$0xff]  ;;  %v3186_v28 = vld [vmem:[#allocation3 + $0x9] sm:$0xff] }
 0x250   : > { %7210 = vpow2.f32 %v2915_v63  ;;  %v2868_v26 = vmin.f32 %v8271_v3, 0.0  ;;  %v3129_v30 = vsel %vm3056_vm7, %v3064_v14, 0.0  ;;  %v2962_v48 = vsel %vm2882_vm15, %v8170_v47, %v5797_v23  ;;  %v6619_v35 = vpop.f32.mrb[16].mxu0  ;;  %6625 = vmatprep.mubr.msk.f32.mxu1 %vm501_vm4, %v3185_v27  ;;  %vm8378_vm10 = vmand %vm2991_vm12, %vm3001_vm5 }
 0x251   : > { %vm2881_vm1 = vcmp.gt.f32.partialorder %v8175_v51, 0.0  ;;  %v2867_v33 = vmin.f32 %v8274_v43, 0.0  ;;  %v7205_v40 = vpop.eup %7204  ;;  %3146 = vst.msk [vmem:[#allocation3 + $0x40] sm:$0x3] %vm3139_vm8, %v3129_v30  ;;  %v3065_v42 = vsel %vm3056_vm7, %v3063_v41, %v3064_v14  ;;  %v3119_v11 = vsel %vm3056_vm7, 0.0, %v3063_v41  ;;  %v2816_v34 = vpop.f32.mrb[17].mxu0  ;;  %6626 = vmatmul.mubr.msk.f32.vlgmr.msra.gmra.mrb[18].mxu1 %vm501_vm4, %v3186_v28 }
 0x252   : > { %v3023_v47 = vsel %vm8292_vm11, %v2962_v48, 0.0  ;;  %v2961_v12 = vsel %vm2881_vm1, %v8175_v51, %v5796_v24  ;;  %3144 = vst.msk [vmem:[#allocation3 + $0x30] sm:$0xff] %vm501_vm4, %v3119_v11  ;;  %3145 = vst.msk [vmem:[#allocation3 + $0x38] sm:$0xff] %vm501_vm4, %v3065_v42  ;;  %v5799_v46 = vadd.f32 -1.0, %v7205_v40  ;;  %v2921_v51 = vmul.f32 1.442695, %v2868_v26  ;;  %6650 = vmatpush3.msk.msra.mxu1 %vm562_vm3, %v8135_v21 }
 0x253   : > { %v3067_v44 = vrot.slane %v3023_v47, 7  ;;  %v3022_v45 = vsel %vm8292_vm11, %v2961_v12, 0.0  ;;  %vm2884_vm6 = vcmp.gt.f32.partialorder %v8204_v1, 0.0  ;;  %v2919_v54 = vmul.f32 1.442695, %v2867_v33  ;;  %6675 = vmatprep.subr.msk.mxu1 %vm562_vm3, %v8309_v39 }
 0x254   : > { %v3066_v50 = vrot.slane %v3022_v45, 7  ;;  %v8334_v29 = vadd.f32 %v6616_v4, %v8120_v15  ;;  %v7207_v55 = vpop.eup %7206  ;;  %v2964_v58 = vsel %vm2884_vm6, %v8204_v1, %v5799_v46  ;;  %7212 = vpow2.f32 %v2921_v51  ;;  %v6622_v60 = vpop.f32.mrb[18].mxu0 }
 0x255   : > { %v3130_v52 = vsel %vm3056_vm7, %v3067_v44, 0.0  ;;  %vm2992_vm13 = vcmp.ge.s32.totalorder %v8187_v56, 0  ;;  %v8342_v21 = vadd.f32 %v2806_v13, %v8122_v16  ;;  %v3025_v31 = vsel %vm8326_vm2, %v2964_v58, 0.0  ;;  %v2826_v61 = vpop.f32.mrb[19].mxu0  ;;  %v8349_v63 = vld [vmem:[#allocation3 + $0x19] sm:$0xff]  ;;  %v8351_v1 = vld [vmem:[#allocation3 + $0x21] sm:$0xff] }
 0x256   : > { %3149 = vst.msk [vmem:[#allocation3 + $0x58] sm:$0x3] %vm3139_vm8, %v3130_v52  ;;  %v3068_v15 = vsel %vm3056_vm7, %v3066_v50, %v3067_v44  ;;  %v3120_v62 = vsel %vm3056_vm7, 0.0, %v3066_v50  ;;  %v5798_v59 = vadd.f32 -1.0, %v7207_v55  ;;  %v3070_v16 = vrot.slane %v3025_v31, 7  ;;  %6628 = vmatprep.mubr.msk.f32.mxu1 %vm501_vm4, %v8349_v63 }
 0x257   : > { %3147 = vst.msk [vmem:[#allocation3 + $0x48] sm:$0xff] %vm501_vm4, %v3120_v62  ;;  %3148 = vst.msk [vmem:[#allocation3 + $0x50] sm:$0xff] %vm501_vm4, %v3068_v15  ;;  %vm2883_vm14 = vcmp.gt.f32.partialorder %v8209_v5, 0.0  ;;  %7214 = vpow2.f32 %v2919_v54  ;;  %v2870_v0 = vmin.f32 %v8334_v29, 0.0  ;;  %vm2886_vm9 = vcmp.gt.f32.partialorder %v8232_v36, 0.0  ;;  %6629 = vmatmul.mubr.msk.f32.gmra.mrb[20].mxu1 %vm501_vm4, %v8351_v1 }
 0x258   : > { %v2963_v2 = vsel %vm2883_vm14, %v8209_v5, %v5798_v59  ;;  %v2869_v4 = vmin.f32 %v8342_v21, 0.0  ;;  %v8363_v6 = vadd.f32 %v6619_v35, %v8124_v17  ;;  %v7209_v7 = vpop.eup %7208  ;;  %v3131_v8 = vsel %vm3056_vm7, %v3070_v16, 0.0 }
 0x259   : > { %v3024_v9 = vsel %vm8326_vm2, %v2963_v2, 0.0  ;;  %v2925_v38 = vmul.f32 1.442695, %v2870_v0  ;;  %v8371_v13 = vadd.f32 %v2816_v34, %v8126_v18  ;;  %3152 = vst.msk [vmem:[#allocation3 + $0x70] sm:$0x3] %vm3139_vm8, %v3131_v8  ;;  %v5801_v14 = vadd.f32 -1.0, %v7209_v7 }
 0x25a   : > { %v7211_v5 = vpop.eup %7210  ;;  %v3069_v22 = vrot.slane %v3024_v9, 7  ;;  %v2923_v10 = vmul.f32 1.442695, %v2869_v4  ;;  %v2872_v23 = vmin.f32 %v8363_v6, 0.0  ;;  %v8383_v25 = vld [vmem:[#allocation3 + $0x31] sm:$0xff]  ;;  %vm2885_vm15 = vcmp.gt.f32.partialorder %v8235_v37, 0.0 }
 0x25b   : > { %v5800_v18 = vadd.f32 -1.0, %v7211_v5  ;;  %7216 = vpow2.f32 %v2925_v38  ;;  %v2871_v41 = vmin.f32 %v8371_v13, 0.0  ;;  %6631 = vmatprep.mubr.msk.f32.mxu1 %vm501_vm4, %v8383_v25  ;;  %v8389_v24 = vld [vmem:[#allocation3 + $0x39] sm:$0xff]  ;;  %v2966_v27 = vsel %vm2886_vm9, %v8232_v36, %v5801_v14 }
 0x25c   : > { %v3071_v53 = vsel %vm3056_vm7, %v3069_v22, %v3070_v16  ;;  %v3121_v26 = vsel %vm3056_vm7, 0.0, %v3069_v22  ;;  %7218 = vpow2.f32 %v2923_v10  ;;  %6632 = vmatmul.mubr.msk.f32.gmra.mrb[22].mxu1 %vm501_vm4, %v8389_v24  ;;  %v3027_v28 = vsel %vm8378_vm10, %v2966_v27, 0.0 }
 0x25d   : > { %3150 = vst.msk [vmem:[#allocation3 + $0x60] sm:$0xff] %vm501_vm4, %v3121_v26  ;;  %3151 = vst.msk [vmem:[#allocation3 + $0x68] sm:$0xff] %vm501_vm4, %v3071_v53  ;;  %v2965_v30 = vsel %vm2885_vm15, %v8235_v37, %v5800_v18  ;;  %vm3002_vm0 = vcmp.lt.s32.totalorder %v8187_v56, 16  ;;  %v2929_v48 = vmul.f32 1.442695, %v2872_v23  ;;  %v3073_v33 = vrot.slane %v3027_v28, 7 }
 0x25e   : > { %v3026_v36 = vsel %vm8378_vm10, %v2965_v30, 0.0  ;;  %v2927_v35 = vmul.f32 1.442695, %v2871_v41  ;;  %v8407_v40 = vadd.f32 %v6622_v60, %v8128_v19  ;;  %v8409_v42 = vld [vmem:[#allocation3 + $0x49] sm:$0xff]  ;;  %v8411_v11 = vld [vmem:[#allocation3 + $0x51] sm:$0xff]  ;;  %v7213_v47 = vpop.eup %7212  ;;  %vm2993_vm11 = vcmp.ge.s32.totalorder %v8190_v57, 0  ;;  %vm8424_vm12 = vmand %vm2992_vm13, %vm3002_vm0 }
 0x25f   : > { %v3072_v12 = vrot.slane %v3026_v36, 7  ;;  %7220 = vpow2.f32 %v2929_v48  ;;  %v8415_v37 = vadd.f32 %v2826_v61, %v8130_v20  ;;  %6634 = vmatprep.mubr.msk.f32.mxu1 %vm501_vm4, %v8409_v42  ;;  %v3132_v34 = vsel %vm3056_vm7, %v3073_v33, 0.0  ;;  %v8622_v18 = vld [vmem:[#allocation3 + $0x22] sm:$0xff] }
 0x260   : > { %v5803_v44 = vadd.f32 -1.0, %v7213_v47  ;;  %7222 = vpow2.f32 %v2927_v35  ;;  %v2874_v45 = vmin.f32 %v8407_v40, 0.0  ;;  %6635 = vmatmul.mubr.msk.f32.gmra.mrb[24].mxu1 %vm501_vm4, %v8411_v11  ;;  %3155 = vst.msk [vmem:[#allocation3 + $0x88] sm:$0x3] %vm3139_vm8, %v3132_v34  ;;  %vm2888_vm5 = vcmp.gt.f32.partialorder %v8271_v3, 0.0 }
 0x261   : > { %v7215_v20 = vpop.eup %7214  ;;  %v3074_v46 = vsel %vm3056_vm7, %v3072_v12, %v3073_v33  ;;  %v3122_v49 = vsel %vm3056_vm7, 0.0, %v3072_v12  ;;  %v2873_v56 = vmin.f32 %v8415_v37, 0.0  ;;  %v2984_v54 = vadd.s32 8, %v8150_v32 }
 0x262   : > { %3153 = vst.msk [vmem:[#allocation3 + $0x78] sm:$0xff] %vm501_vm4, %v3122_v49  ;;  %3154 = vst.msk [vmem:[#allocation3 + $0x80] sm:$0xff] %vm501_vm4, %v3074_v46  ;;  %v2968_v51 = vsel %vm2888_vm5, %v8271_v3, %v5803_v44  ;;  %v5802_v50 = vadd.f32 -1.0, %v7215_v20  ;;  %v2933_v55 = vmul.f32 1.442695, %v2874_v45  ;;  %vm2887_vm1 = vcmp.gt.f32.partialorder %v8274_v43, 0.0 }
 0x263   : > { %v3029_v52 = vsel %vm8424_vm12, %v2968_v51, 0.0  ;;  %vm3003_vm2 = vcmp.lt.s32.totalorder %v8190_v57, 16  ;;  %v2931_v58 = vmul.f32 1.442695, %v2873_v56  ;;  %vm2994_vm13 = vcmp.ge.s32.totalorder %v2984_v54, 0 }
 0x264   : > { %v3076_v60 = vrot.slane %v3029_v52, 7  ;;  %v2967_v15 = vsel %vm2887_vm1, %v8274_v43, %v5802_v50  ;;  %7224 = vpow2.f32 %v2933_v55  ;;  %v8445_v62 = vld [vmem:[#allocation3 + $0x61] sm:$0xff]  ;;  %v8447_v31 = vld [vmem:[#allocation3 + $0x69] sm:$0xff]  ;;  %vm8458_vm6 = vmand %vm2993_vm11, %vm3003_vm2  ;;  %vm2890_vm14 = vcmp.gt.f32.partialorder %v8334_v29, 0.0 }
 0x265   : > { %v7217_v3 = vpop.eup %7216  ;;  %v3028_v59 = vsel %vm8424_vm12, %v2967_v15, 0.0  ;;  %7226 = vpow2.f32 %v2931_v58  ;;  %6637 = vmatprep.mubr.msk.f32.mxu1 %vm501_vm4, %v8445_v62  ;;  %vm3004_vm9 = vcmp.lt.s32.totalorder %v2984_v54, 16  ;;  %v2985_v7 = vadd.s32 9, %v8150_v32  ;;  %v3168_v15 = vld [vmem:[#allocation3] sm:$0xff]  ;;  %v8575_v43 = vld [vmem:[#allocation3 + $0x50] sm:$0xff] }
 0x266   : > { %v7219_v61 = vpop.eup %7218  ;;  %v3133_v16 = vsel %vm3056_vm7, %v3076_v60, 0.0  ;;  %v3075_v0 = vrot.slane %v3028_v59, 7  ;;  %v5805_v2 = vadd.f32 -1.0, %v7217_v3  ;;  %6638 = vmatmul.mubr.msk.f32.gmra.mrb[26].mxu1 %vm501_vm4, %v8447_v31  ;;  %vm2889_vm10 = vcmp.gt.f32.partialorder %v8342_v21, 0.0  ;;  %vm8484_vm15 = vmand %vm2994_vm13, %vm3004_vm9  ;;  %v3169_v3 = vld [vmem:[#allocation3 + $0x8] sm:$0xff] }
 0x267   : > { %3158 = vst.msk [vmem:[#allocation3 + $0xa0] sm:$0x3] %vm3139_vm8, %v3133_v16  ;;  %v5804_v4 = vadd.f32 -1.0, %v7219_v61  ;;  %vm2892_vm0 = vcmp.gt.f32.partialorder %v8363_v6, 0.0  ;;  %vm2995_vm11 = vcmp.ge.s32.totalorder %v2985_v7, 0  ;;  %vm2891_vm12 = vcmp.gt.f32.partialorder %v8371_v13, 0.0 }
 0x268   : > { %v3077_v8 = vsel %vm3056_vm7, %v3075_v0, %v3076_v60  ;;  %v3123_v57 = vsel %vm3056_vm7, 0.0, %v3075_v0  ;;  %v2970_v9 = vsel %vm2890_vm14, %v8334_v29, %v5805_v2  ;;  %vm3005_vm5 = vcmp.lt.s32.totalorder %v2985_v7, 16  ;;  %v5864_v59 = vld [vmem:[%s9003_s2 + $0xc] sm:$0xf]  ;;  %v8552_v61 = vld [vmem:[#allocation3 + $0x18] sm:$0xff]  ;;  %v8559_v16 = vld [vmem:[#allocation3 + $0x20] sm:$0xff] }
 0x269   : > { %v7221_v38 = vpop.eup %7220  ;;  %3156 = vst.msk [vmem:[#allocation3 + $0x90] sm:$0xff] %vm501_vm4, %v3123_v57  ;;  %3157 = vst.msk [vmem:[#allocation3 + $0x98] sm:$0xff] %vm501_vm4, %v3077_v8  ;;  %v3031_v5 = vsel %vm8458_vm6, %v2970_v9, 0.0  ;;  %v2969_v22 = vsel %vm2889_vm10, %v8342_v21, %v5804_v4  ;;  %v8476_v14 = vld [vmem:[#allocation3 + $0x79] sm:$0xff]  ;;  %v8478_v32 = vld [vmem:[#allocation3 + $0x81] sm:$0xff]  ;;  %vm2894_vm2 = vcmp.gt.f32.partialorder %v8407_v40, 0.0 }
 0x26a   : > { %v7223_v17 = vpop.eup %7222  ;;  %v3079_v10 = vrot.slane %v3031_v5, 7  ;;  %v3030_v29 = vsel %vm8458_vm6, %v2969_v22, 0.0  ;;  %v5807_v23 = vadd.f32 -1.0, %v7221_v38  ;;  %6640 = vmatprep.mubr.msk.f32.mxu1 %vm501_vm4, %v8476_v14  ;;  %vm8507_vm1 = vmand %vm2995_vm11, %vm3005_vm5  ;;  %vm2893_vm6 = vcmp.gt.f32.partialorder %v8415_v37, 0.0  ;;  %v8563_v0 = vld [vmem:[#allocation3 + $0x30] sm:$0xff]  ;;  %v8567_v2 = vld [vmem:[#allocation3 + $0x38] sm:$0xff] }
 0x26b   : > { %v3078_v21 = vrot.slane %v3030_v29, 7  ;;  %v5806_v41 = vadd.f32 -1.0, %v7223_v17  ;;  %6641 = vmatmul.mubr.msk.f32.gmra.mrb[28].mxu1 %vm501_vm4, %v8478_v32  ;;  %v8579_v4 = vld [vmem:[#allocation3 + $0x60] sm:$0xff]  ;;  %v8583_v7 = vld [vmem:[#allocation3 + $0x68] sm:$0xff]  ;;  %v8587_v8 = vld [vmem:[#allocation3 + $0x78] sm:$0xff] }
 0x26c   : > { %v3134_v53 = vsel %vm3056_vm7, %v3079_v10, 0.0  ;;  %v2972_v26 = vsel %vm2892_vm0, %v8363_v6, %v5807_v23  ;;  %v8591_v57 = vld [vmem:[#allocation3 + $0x80] sm:$0xff]  ;;  %v5882_v29 = vld [vmem:[%s9003_s2 + $0x10] sm:$0xf] }
 0x26d   : > { %3161 = vst.msk [vmem:[#allocation3 + $0xb8] sm:$0x3] %vm3139_vm8, %v3134_v53  ;;  %v3080_v27 = vsel %vm3056_vm7, %v3078_v21, %v3079_v10  ;;  %v3124_v28 = vsel %vm3056_vm7, 0.0, %v3078_v21  ;;  %v3033_v30 = vsel %vm8484_vm15, %v2972_v26, 0.0  ;;  %v2971_v48 = vsel %vm2891_vm12, %v8371_v13, %v5806_v41  ;;  %v3595_v17 = vld [vmem:[#allocation3 + $0x2] sm:$0xff]  ;;  %v3596_v10 = vld [vmem:[#allocation3 + $0xa] sm:$0xff] }
 0x26e   : > { %v7225_v33 = vpop.eup %7224  ;;  %3159 = vst.msk [vmem:[#allocation3 + $0xa8] sm:$0xff] %vm501_vm4, %v3124_v28  ;;  %3160 = vst.msk [vmem:[#allocation3 + $0xb0] sm:$0xff] %vm501_vm4, %v3080_v27  ;;  %v3082_v6 = vrot.slane %v3033_v30, 7  ;;  %v3032_v36 = vsel %vm8484_vm15, %v2971_v48, 0.0  ;;  %v8616_v23 = vld [vmem:[#allocation3 + $0x1a] sm:$0xff]  ;;  %v8626_v21 = vld [vmem:[#allocation3 + $0x32] sm:$0xff] }
 0x26f   : > { %v7227_v35 = vpop.eup %7226  ;;  %v3081_v47 = vrot.slane %v3032_v36, 7  ;;  %v5809_v12 = vadd.f32 -1.0, %v7225_v33  ;;  %v8630_v41 = vld [vmem:[#allocation3 + $0x3a] sm:$0xff]  ;;  %v8634_v53 = vld [vmem:[#allocation3 + $0x4a] sm:$0xff]  ;;  %v8638_v26 = vld [vmem:[#allocation3 + $0x52] sm:$0xff] }
 0x270   : > { %v3135_v44 = vsel %vm3056_vm7, %v3082_v6, 0.0  ;;  %v5808_v13 = vadd.f32 -1.0, %v7227_v35  ;;  %v8513_v19 = vld [vmem:[#allocation3 + $0x91] sm:$0xff]  ;;  %v8515_v45 = vld [vmem:[#allocation3 + $0x99] sm:$0xff]  ;;  %v8642_v27 = vld [vmem:[#allocation3 + $0x62] sm:$0xff] }
 0x271   : > { %3164 = vst.msk [vmem:[#allocation3 + $0xd0] sm:$0x3] %vm3139_vm8, %v3135_v44  ;;  %v3083_v20 = vsel %vm3056_vm7, %v3081_v47, %v3082_v6  ;;  %v3125_v46 = vsel %vm3056_vm7, 0.0, %v3081_v47  ;;  %v2974_v49 = vsel %vm2894_vm2, %v8407_v40, %v5809_v12  ;;  %6643 = vmatprep.mubr.msk.f32.mxu1 %vm501_vm4, %v8513_v19  ;;  %v8595_v9 = vld [vmem:[#allocation3 + $0x90] sm:$0xff]  ;;  %v8599_v38 = vld [vmem:[#allocation3 + $0x98] sm:$0xff]  ;;  %v8654_v48 = vld [vmem:[#allocation3 + $0x82] sm:$0xff] }
 0x272   : > { %3162 = vst.msk [vmem:[#allocation3 + $0xc0] sm:$0xff] %vm501_vm4, %v3125_v46  ;;  %3163 = vst.msk [vmem:[#allocation3 + $0xc8] sm:$0xff] %vm501_vm4, %v3083_v20  ;;  %v3035_v56 = vsel %vm8507_vm1, %v2974_v49, 0.0  ;;  %v2973_v51 = vsel %vm2893_vm6, %v8415_v37, %v5808_v13  ;;  %6644 = vmatmul.mubr.msk.f32.gmra.mrb[30].mxu1 %vm501_vm4, %v8515_v45  ;;  %v8646_v28 = vld [vmem:[#allocation3 + $0x6a] sm:$0xff]  ;;  %v8650_v30 = vld [vmem:[#allocation3 + $0x7a] sm:$0xff] }
 0x273   : > { %v3085_v50 = vrot.slane %v3035_v56, 7  ;;  %v3034_v40 = vsel %vm8507_vm1, %v2973_v51, 0.0  ;;  %v8658_v33 = vld [vmem:[#allocation3 + $0x92] sm:$0xff]  ;;  %v8662_v6 = vld [vmem:[#allocation3 + $0x9a] sm:$0xff] }
 0x274   : > { %v3084_v54 = vrot.slane %v3034_v40, 7  ;;  %v5900_v47 = vld [vmem:[%s9003_s2 + $0x14] sm:$0xf]  ;;  %v5918_v44 = vld [vmem:[%s9003_s2 + $0x18] sm:$0xf] }
 0x275   : > { %v3136_v55 = vsel %vm3056_vm7, %v3085_v50, 0.0  ;;  %v8534_v52 = vld [vmem:[#allocation3 + $0xa9] sm:$0xff]  ;;  %v8536_v58 = vld [vmem:[#allocation3 + $0xb1] sm:$0xff]  ;;  %v5936_v13 = vld [vmem:[%s9003_s2 + $0x1c] sm:$0xf] }
 0x276   : > { %3167 = vst.msk [vmem:[#allocation3 + $0xe8] sm:$0x3] %vm3139_vm8, %v3136_v55  ;;  %v3086_v60 = vsel %vm3056_vm7, %v3084_v54, %v3085_v50  ;;  %v3126_v37 = vsel %vm3056_vm7, 0.0, %v3084_v54  ;;  %6646 = vmatprep.mubr.msk.f32.mxu1 %vm501_vm4, %v8534_v52  ;;  %v8603_v5 = vld [vmem:[#allocation3 + $0xa8] sm:$0xff]  ;;  %v8607_v22 = vld [vmem:[#allocation3 + $0xb0] sm:$0xff]  ;;  %v5212_v50 = vld [vmem:[%s8871_s8 + $0x18] sm:$0xff] }
 0x277   : > { %3165 = vst.msk [vmem:[#allocation3 + $0xd8] sm:$0xff] %vm501_vm4, %v3126_v37  ;;  %3166 = vst.msk [vmem:[#allocation3 + $0xe0] sm:$0xff] %vm501_vm4, %v3086_v60  ;;  %6647 = vmatmul.mubr.msk.f32.gmra.mrb[32].mxu1 %vm501_vm4, %v8536_v58  ;;  %v8666_v36 = vld [vmem:[#allocation3 + $0xaa] sm:$0xff]  ;;  %v8670_v35 = vld [vmem:[#allocation3 + $0xb2] sm:$0xff] }
 0x278   : > { %6651 = vmatprep.mubr.msk.f32.mxu1 %vm501_vm4, %v3168_v15  ;;  %v5954_v49 = vld [vmem:[%s9003_s2 + $0x20] sm:$0xf]  ;;  %v5211_v54 = vld [vmem:[%s8871_s8 + $0x10] sm:$0xff] }
 0x279   : > { %v3840_v12 = vld [vmem:[#allocation3 + $0xc0] sm:$0xff]  ;;  %v3841_v34 = vld [vmem:[#allocation3 + $0xc8] sm:$0xff] }
 0x27a   : > { %v4300_v20 = vld [vmem:[#allocation3 + $0xc2] sm:$0xff]  ;;  %v4301_v46 = vld [vmem:[#allocation3 + $0xca] sm:$0xff] }
 0x27b   : > { %6652 = vmatmul.mubr.msk.f32.vlgmr.msra.gmra.mrb[18].mxu1 %vm501_vm4, %v3169_v3 }
 0x27c   : > { %6676 = vmatpush3.msk.msra.mxu1 %vm562_vm3, %v8309_v39  ;;  %6654 = vmatprep.mubr.msk.f32.mxu1 %vm501_vm4, %v8552_v61  ;;  %v8571_v39 = vld [vmem:[#allocation3 + $0x48] sm:$0xff] }
 0x27d   : > { %6701 = vmatprep.subr.msk.mxu1 %vm562_vm3, %v5864_v59 }
 0x27e   : > { %v4531_v56 = vld [vmem:[#allocation3 + $0xd8] sm:$0xff]  ;;  %v4532_v51 = vld [vmem:[#allocation3 + $0xe0] sm:$0xff] }
 0x27f   : > { %6655 = vmatmul.mubr.msk.f32.gmra.mrb[20].mxu1 %vm501_vm4, %v8559_v16 }
 0x280   : > { %6657 = vmatprep.mubr.msk.f32.mxu1 %vm501_vm4, %v8563_v0 }
 0x283   : > { %6658 = vmatmul.mubr.msk.f32.gmra.mrb[22].mxu1 %vm501_vm4, %v8567_v2 }
 0x284   : > { %6660 = vmatprep.mubr.msk.f32.mxu1 %vm501_vm4, %v8571_v39 }
 0x287   : > { %6661 = vmatmul.mubr.msk.f32.gmra.mrb[24].mxu1 %vm501_vm4, %v8575_v43 }
 0x288   : > { %6663 = vmatprep.mubr.msk.f32.mxu1 %vm501_vm4, %v8579_v4 }
 0x28b   : > { %6664 = vmatmul.mubr.msk.f32.gmra.mrb[26].mxu1 %vm501_vm4, %v8583_v7 }
 0x28c   : > { %6666 = vmatprep.mubr.msk.f32.mxu1 %vm501_vm4, %v8587_v8 }
 0x28f   : > { %6667 = vmatmul.mubr.msk.f32.gmra.mrb[28].mxu1 %vm501_vm4, %v8591_v57 }
 0x290   : > { %6669 = vmatprep.mubr.msk.f32.mxu1 %vm501_vm4, %v8595_v9 }
 0x293   : > { %6670 = vmatmul.mubr.msk.f32.gmra.mrb[30].mxu1 %vm501_vm4, %v8599_v38 }
 0x294   : > { %6672 = vmatprep.mubr.msk.f32.mxu1 %vm501_vm4, %v8603_v5 }
 0x297   : > { %6673 = vmatmul.mubr.msk.f32.gmra.mrb[32].mxu1 %vm501_vm4, %v8607_v22 }
 0x298   : > { %6677 = vmatprep.mubr.msk.f32.mxu1 %vm501_vm4, %v3595_v17 }
 0x29b   : > { %6678 = vmatmul.mubr.msk.f32.vlgmr.msra.gmra.mrb[18].mxu1 %vm501_vm4, %v3596_v10 }
 0x29c   : > { %6702 = vmatpush3.msk.msra.mxu1 %vm562_vm3, %v5864_v59  ;;  %6680 = vmatprep.mubr.msk.f32.mxu1 %vm501_vm4, %v8616_v23  ;;  %v5214_v59 = vld [vmem:[%s8871_s8 + $0x28] sm:$0xff] }
 0x29d   : > { %6727 = vmatprep.subr.msk.mxu1 %vm562_vm3, %v5882_v29 }
 0x29f   : > { %6681 = vmatmul.mubr.msk.f32.gmra.mrb[20].mxu1 %vm501_vm4, %v8622_v18 }
 0x2a0   : > { %6683 = vmatprep.mubr.msk.f32.mxu1 %vm501_vm4, %v8626_v21 }
 0x2a3   : > { %6684 = vmatmul.mubr.msk.f32.gmra.mrb[22].mxu1 %vm501_vm4, %v8630_v41 }
 0x2a4   : > { %6686 = vmatprep.mubr.msk.f32.mxu1 %vm501_vm4, %v8634_v53 }
 0x2a7   : > { %6687 = vmatmul.mubr.msk.f32.gmra.mrb[24].mxu1 %vm501_vm4, %v8638_v26 }
 0x2a8   : > { %6689 = vmatprep.mubr.msk.f32.mxu1 %vm501_vm4, %v8642_v27 }
 0x2ab   : > { %6690 = vmatmul.mubr.msk.f32.gmra.mrb[26].mxu1 %vm501_vm4, %v8646_v28 }
 0x2ac   : > { %6692 = vmatprep.mubr.msk.f32.mxu1 %vm501_vm4, %v8650_v30 }
 0x2af   : > { %6693 = vmatmul.mubr.msk.f32.gmra.mrb[28].mxu1 %vm501_vm4, %v8654_v48 }
 0x2b0   : > { %6695 = vmatprep.mubr.msk.f32.mxu1 %vm501_vm4, %v8658_v33 }
 0x2b3   : > { %6696 = vmatmul.mubr.msk.f32.gmra.mrb[30].mxu1 %vm501_vm4, %v8662_v6 }
 0x2b4   : > { %6698 = vmatprep.mubr.msk.f32.mxu1 %vm501_vm4, %v8666_v36 }
 0x2b7   : > { %6699 = vmatmul.mubr.msk.f32.gmra.mrb[32].mxu1 %vm501_vm4, %v8670_v35 }
 0x2b8   : > { %6703 = vmatprep.mubr.msk.f32.mxu1 %vm501_vm4, %v8552_v61 }
 0x2bb   : > { %6704 = vmatmul.mubr.msk.f32.vlgmr.msra.gmra.mrb[18].mxu1 %vm501_vm4, %v8559_v16  ;;  %v5213_v16 = vld [vmem:[%s8871_s8 + $0x20] sm:$0xff] }
 0x2bc   : > { %6728 = vmatpush3.msk.msra.mxu1 %vm562_vm3, %v5882_v29  ;;  %6706 = vmatprep.mubr.msk.f32.mxu1 %vm501_vm4, %v8563_v0 }
 0x2bd   : > { %6753 = vmatprep.subr.msk.mxu1 %vm562_vm3, %v5900_v47 }
 0x2bf   : > { %6707 = vmatmul.mubr.msk.f32.gmra.mrb[20].mxu1 %vm501_vm4, %v8567_v2 }
 0x2c0   : > { %6709 = vmatprep.mubr.msk.f32.mxu1 %vm501_vm4, %v8571_v39 }
 0x2c3   : > { %6710 = vmatmul.mubr.msk.f32.gmra.mrb[22].mxu1 %vm501_vm4, %v8575_v43 }
 0x2c4   : > { %6712 = vmatprep.mubr.msk.f32.mxu1 %vm501_vm4, %v8579_v4 }
 0x2c7   : > { %6713 = vmatmul.mubr.msk.f32.gmra.mrb[24].mxu1 %vm501_vm4, %v8583_v7 }
 0x2c8   : > { %6715 = vmatprep.mubr.msk.f32.mxu1 %vm501_vm4, %v8587_v8 }
 0x2cb   : > { %6716 = vmatmul.mubr.msk.f32.gmra.mrb[26].mxu1 %vm501_vm4, %v8591_v57 }
 0x2cc   : > { %6718 = vmatprep.mubr.msk.f32.mxu1 %vm501_vm4, %v8595_v9 }
 0x2cf   : > { %6719 = vmatmul.mubr.msk.f32.gmra.mrb[28].mxu1 %vm501_vm4, %v8599_v38 }
 0x2d0   : > { %6721 = vmatprep.mubr.msk.f32.mxu1 %vm501_vm4, %v8603_v5 }
 0x2d3   : > { %6722 = vmatmul.mubr.msk.f32.gmra.mrb[30].mxu1 %vm501_vm4, %v8607_v22 }
 0x2d4   : > { %6724 = vmatprep.mubr.msk.f32.mxu1 %vm501_vm4, %v3840_v12 }
 0x2d7   : > { %6725 = vmatmul.mubr.msk.f32.gmra.mrb[32].mxu1 %vm501_vm4, %v3841_v34 }
 0x2d8   : > { %6729 = vmatprep.mubr.msk.f32.mxu1 %vm501_vm4, %v8349_v63  ;;  %v4070_v63 = vld [vmem:[#allocation3 + $0xc1] sm:$0xff] }
 0x2db   : > { %6730 = vmatmul.mubr.msk.f32.vlgmr.msra.gmra.mrb[18].mxu1 %vm501_vm4, %v8351_v1  ;;  %v4071_v1 = vld [vmem:[#allocation3 + $0xc9] sm:$0xff] }
 0x2dc   : > { %6754 = vmatpush3.msk.msra.mxu1 %vm562_vm3, %v5900_v47  ;;  %6732 = vmatprep.mubr.msk.f32.mxu1 %vm501_vm4, %v8383_v25 }
 0x2dd   : > { %6779 = vmatprep.subr.msk.mxu1 %vm562_vm3, %v5918_v44 }
 0x2df   : > { %6733 = vmatmul.mubr.msk.f32.gmra.mrb[20].mxu1 %vm501_vm4, %v8389_v24 }
 0x2e0   : > { %6735 = vmatprep.mubr.msk.f32.mxu1 %vm501_vm4, %v8409_v42 }
 0x2e3   : > { %6736 = vmatmul.mubr.msk.f32.gmra.mrb[22].mxu1 %vm501_vm4, %v8411_v11 }
 0x2e4   : > { %6738 = vmatprep.mubr.msk.f32.mxu1 %vm501_vm4, %v8445_v62 }
 0x2e7   : > { %6739 = vmatmul.mubr.msk.f32.gmra.mrb[24].mxu1 %vm501_vm4, %v8447_v31 }
 0x2e8   : > { %6741 = vmatprep.mubr.msk.f32.mxu1 %vm501_vm4, %v8476_v14 }
 0x2eb   : > { %6742 = vmatmul.mubr.msk.f32.gmra.mrb[26].mxu1 %vm501_vm4, %v8478_v32 }
 0x2ec   : > { %6744 = vmatprep.mubr.msk.f32.mxu1 %vm501_vm4, %v8513_v19 }
 0x2ef   : > { %6745 = vmatmul.mubr.msk.f32.gmra.mrb[28].mxu1 %vm501_vm4, %v8515_v45 }
 0x2f0   : > { %6747 = vmatprep.mubr.msk.f32.mxu1 %vm501_vm4, %v8534_v52 }
 0x2f3   : > { %6748 = vmatmul.mubr.msk.f32.gmra.mrb[30].mxu1 %vm501_vm4, %v8536_v58 }
 0x2f4   : > { %6750 = vmatprep.mubr.msk.f32.mxu1 %vm501_vm4, %v4070_v63 }
 0x2f7   : > { %6751 = vmatmul.mubr.msk.f32.gmra.mrb[32].mxu1 %vm501_vm4, %v4071_v1 }
 0x2f8   : > { %6755 = vmatprep.mubr.msk.f32.mxu1 %vm501_vm4, %v8616_v23 }
 0x2fb   : > { %6756 = vmatmul.mubr.msk.f32.vlgmr.msra.gmra.mrb[18].mxu1 %vm501_vm4, %v8622_v18 }
 0x2fc   : > { %6780 = vmatpush3.msk.msra.mxu1 %vm562_vm3, %v5918_v44  ;;  %6758 = vmatprep.mubr.msk.f32.mxu1 %vm501_vm4, %v8626_v21 }
 0x2fd   : > { %6805 = vmatprep.subr.msk.mxu1 %vm562_vm3, %v5936_v13 }
 0x2ff   : > { %6759 = vmatmul.mubr.msk.f32.gmra.mrb[20].mxu1 %vm501_vm4, %v8630_v41 }
 0x300   : > { %6761 = vmatprep.mubr.msk.f32.mxu1 %vm501_vm4, %v8634_v53 }
 0x303   : > { %6762 = vmatmul.mubr.msk.f32.gmra.mrb[22].mxu1 %vm501_vm4, %v8638_v26 }
 0x304   : > { %6764 = vmatprep.mubr.msk.f32.mxu1 %vm501_vm4, %v8642_v27 }
 0x307   : > { %6765 = vmatmul.mubr.msk.f32.gmra.mrb[24].mxu1 %vm501_vm4, %v8646_v28 }
 0x308   : > { %6767 = vmatprep.mubr.msk.f32.mxu1 %vm501_vm4, %v8650_v30 }
 0x30b   : > { %6768 = vmatmul.mubr.msk.f32.gmra.mrb[26].mxu1 %vm501_vm4, %v8654_v48 }
 0x30c   : > { %6770 = vmatprep.mubr.msk.f32.mxu1 %vm501_vm4, %v8658_v33 }
 0x30f   : > { %6771 = vmatmul.mubr.msk.f32.gmra.mrb[28].mxu1 %vm501_vm4, %v8662_v6 }
 0x310   : > { %6773 = vmatprep.mubr.msk.f32.mxu1 %vm501_vm4, %v8666_v36 }
 0x313   : > { %6774 = vmatmul.mubr.msk.f32.gmra.mrb[30].mxu1 %vm501_vm4, %v8670_v35 }
 0x314   : > { %6776 = vmatprep.mubr.msk.f32.mxu1 %vm501_vm4, %v4300_v20 }
 0x317   : > { %6777 = vmatmul.mubr.msk.f32.gmra.mrb[32].mxu1 %vm501_vm4, %v4301_v46 }
 0x318   : > { %6781 = vmatprep.mubr.msk.f32.mxu1 %vm501_vm4, %v8563_v0 }
 0x31b   : > { %6782 = vmatmul.mubr.msk.f32.vlgmr.msra.gmra.mrb[18].mxu1 %vm501_vm4, %v8567_v2 }
 0x31c   : > { %6806 = vmatpush3.msk.msra.mxu1 %vm562_vm3, %v5936_v13  ;;  %6784 = vmatprep.mubr.msk.f32.mxu1 %vm501_vm4, %v8571_v39 }
 0x31d   : > { %6831 = vmatprep.subr.msk.mxu1 %vm562_vm3, %v5954_v49 }
 0x31f   : > { %6785 = vmatmul.mubr.msk.f32.gmra.mrb[20].mxu1 %vm501_vm4, %v8575_v43 }
 0x320   : > { %6787 = vmatprep.mubr.msk.f32.mxu1 %vm501_vm4, %v8579_v4 }
 0x323   : > { %6788 = vmatmul.mubr.msk.f32.gmra.mrb[22].mxu1 %vm501_vm4, %v8583_v7 }
 0x324   : > { %6790 = vmatprep.mubr.msk.f32.mxu1 %vm501_vm4, %v8587_v8 }
 0x327   : > { %6791 = vmatmul.mubr.msk.f32.gmra.mrb[24].mxu1 %vm501_vm4, %v8591_v57  ;;  %v5216_v57 = vld [vmem:[%s8871_s8 + $0x38] sm:$0xff] }
 0x328   : > { %6793 = vmatprep.mubr.msk.f32.mxu1 %vm501_vm4, %v8595_v9 }
 0x32b   : > { %6794 = vmatmul.mubr.msk.f32.gmra.mrb[26].mxu1 %vm501_vm4, %v8599_v38  ;;  %v5215_v38 = vld [vmem:[%s8871_s8 + $0x30] sm:$0xff] }
 0x32c   : > { %6796 = vmatprep.mubr.msk.f32.mxu1 %vm501_vm4, %v8603_v5 }
 0x32f   : > { %6797 = vmatmul.mubr.msk.f32.gmra.mrb[28].mxu1 %vm501_vm4, %v8607_v22 }
 0x330   : > { %6799 = vmatprep.mubr.msk.f32.mxu1 %vm501_vm4, %v3840_v12  ;;  %v5220_v12 = vld [vmem:[%s8871_s8 + $0x58] sm:$0xff] }
 0x333   : > { %6800 = vmatmul.mubr.msk.f32.gmra.mrb[30].mxu1 %vm501_vm4, %v3841_v34 }
 0x334   : > { %6802 = vmatprep.mubr.msk.f32.mxu1 %vm501_vm4, %v4531_v56 }
 0x337   : > { %6803 = vmatmul.mubr.msk.f32.gmra.mrb[32].mxu1 %vm501_vm4, %v4532_v51 }
 0x338   : > { %6807 = vmatprep.mubr.msk.f32.mxu1 %vm501_vm4, %v8383_v25  ;;  %v4761_v25 = vld [vmem:[#allocation3 + $0xd9] sm:$0xff] }
 0x33b   : > { %6808 = vmatmul.mubr.msk.f32.vlgmr.msra.gmra.mrb[18].mxu1 %vm501_vm4, %v8389_v24  ;;  %v4762_v24 = vld [vmem:[#allocation3 + $0xe1] sm:$0xff] }
 0x33c   : > { %6832 = vmatpush3.msk.msra.mxu1 %vm562_vm3, %v5954_v49  ;;  %6810 = vmatprep.mubr.msk.f32.mxu1 %vm501_vm4, %v8409_v42  ;;  %v4991_v42 = vld [vmem:[#allocation3 + $0xda] sm:$0xff] }
 0x33f   : > { %6811 = vmatmul.mubr.msk.f32.gmra.mrb[20].mxu1 %vm501_vm4, %v8411_v11  ;;  %v4992_v11 = vld [vmem:[#allocation3 + $0xe2] sm:$0xff] }
 0x340   : > { %6813 = vmatprep.mubr.msk.f32.mxu1 %vm501_vm4, %v8445_v62  ;;  %v5210_v62 = vld [vmem:[%s8871_s8 + $0x8] sm:$0xff] }
 0x343   : > { %6814 = vmatmul.mubr.msk.f32.gmra.mrb[22].mxu1 %vm501_vm4, %v8447_v31  ;;  %v5209_v31 = vld [vmem:[%s8871_s8] sm:$0xff] }
 0x344   : > { %6816 = vmatprep.mubr.msk.f32.mxu1 %vm501_vm4, %v8476_v14 }
 0x347   : > { %6817 = vmatmul.mubr.msk.f32.gmra.mrb[24].mxu1 %vm501_vm4, %v8478_v32 }
 0x348   : > { %6819 = vmatprep.mubr.msk.f32.mxu1 %vm501_vm4, %v8513_v19 }
 0x34b   : > { %6820 = vmatmul.mubr.msk.f32.gmra.mrb[26].mxu1 %vm501_vm4, %v8515_v45 }
 0x34c   : > { %6822 = vmatprep.mubr.msk.f32.mxu1 %vm501_vm4, %v8534_v52 }
 0x34f   : > { %6823 = vmatmul.mubr.msk.f32.gmra.mrb[28].mxu1 %vm501_vm4, %v8536_v58 }
 0x350   : > { %6825 = vmatprep.mubr.msk.f32.mxu1 %vm501_vm4, %v4070_v63  ;;  %v5219_v63 = vld [vmem:[%s8871_s8 + $0x50] sm:$0xff] }
 0x353   : > { %6826 = vmatmul.mubr.msk.f32.gmra.mrb[30].mxu1 %vm501_vm4, %v4071_v1 }
 0x354   : > { %6828 = vmatprep.mubr.msk.f32.mxu1 %vm501_vm4, %v4761_v25 }
 0x357   : > { %6829 = vmatmul.mubr.msk.f32.gmra.mrb[32].mxu1 %vm501_vm4, %v4762_v24 }
 0x358   : > { %6833 = vmatprep.mubr.msk.f32.mxu1 %vm501_vm4, %v8626_v21  ;;  %v5218_v21 = vld [vmem:[%s8871_s8 + $0x48] sm:$0xff] }
 0x35b   : > { %6834 = vmatmul.mubr.msk.f32.vlgmr.msra.gmra.mrb[18].mxu1 %vm501_vm4, %v8630_v41 }
 0x35c   : > { %6836 = vmatprep.mubr.msk.f32.mxu1 %vm501_vm4, %v8634_v53  ;;  %v5217_v53 = vld [vmem:[%s8871_s8 + $0x40] sm:$0xff] }
 0x35f   : > { %6837 = vmatmul.mubr.msk.f32.gmra.mrb[20].mxu1 %vm501_vm4, %v8638_v26 }
 0x360   : > { %6839 = vmatprep.mubr.msk.f32.mxu1 %vm501_vm4, %v8642_v27 }
 0x363   : > { %6840 = vmatmul.mubr.msk.f32.gmra.mrb[22].mxu1 %vm501_vm4, %v8646_v28 }
 0x364   : > { %6842 = vmatprep.mubr.msk.f32.mxu1 %vm501_vm4, %v8650_v30 }
 0x367   : > { %6843 = vmatmul.mubr.msk.f32.gmra.mrb[24].mxu1 %vm501_vm4, %v8654_v48 }
 0x368   : > { %6845 = vmatprep.mubr.msk.f32.mxu1 %vm501_vm4, %v8658_v33 }
 0x36b   : > { %6846 = vmatmul.mubr.msk.f32.gmra.mrb[26].mxu1 %vm501_vm4, %v8662_v6 }
 0x36c   : > { %6848 = vmatprep.mubr.msk.f32.mxu1 %vm501_vm4, %v8666_v36 }
 0x36f   : > { %6849 = vmatmul.mubr.msk.f32.gmra.mrb[28].mxu1 %vm501_vm4, %v8670_v35 }
 0x370   : > { %6851 = vmatprep.mubr.msk.f32.mxu1 %vm501_vm4, %v4300_v20 }
 0x373   : > { %6852 = vmatmul.mubr.msk.f32.gmra.mrb[30].mxu1 %vm501_vm4, %v4301_v46 }
 0x374   : > { %6854 = vmatprep.mubr.msk.f32.mxu1 %vm501_vm4, %v4991_v42 }
 0x377   : > { %6855 = vmatmul.mubr.msk.f32.gmra.mrb[32].mxu1 %vm501_vm4, %v4992_v11 }
 0x42e   : > { %v6835_v14 = vpop.f32.mrb[18].mxu1 }
 0x42f   : > { %v5226_v32 = vadd.f32 %v6835_v14, %v5210_v62  ;;  %v5112_v19 = vpop.f32.mrb[19].mxu1 }
 0x430   : > { %v8875_v45 = vadd.f32 %v5209_v31, %v5112_v19  ;;  %v5222_v31 = vld [vmem:[%s8871_s8 + $0x68] sm:$0xff]  ;;  %v5221_v19 = vld [vmem:[%s8871_s8 + $0x60] sm:$0xff] }
 0x431   : > { %v5242_v40 = vmin.f32 %v5226_v32, 0.0  ;;  %vm5258_vm3 = vcmp.gt.f32.partialorder %v5226_v32, 0.0 }
 0x432   : > { %v5241_v55 = vmin.f32 %v8875_v45, 0.0  ;;  %v6838_v52 = vpop.f32.mrb[20].mxu1  ;;  %vm5257_vm7 = vcmp.gt.f32.partialorder %v8875_v45, 0.0 }
 0x433   : > { %v5275_v58 = vmul.f32 1.442695, %v5242_v40  ;;  %v8880_v60 = vadd.f32 %v6838_v52, %v5212_v50  ;;  %v5122_v37 = vpop.f32.mrb[21].mxu1 }
 0x434   : > { %v5273_v15 = vmul.f32 1.442695, %v5241_v55  ;;  %v8882_v3 = vadd.f32 %v5211_v54, %v5122_v37 }
 0x435   : > { %7228 = vpow2.f32 %v5275_v58  ;;  %v5244_v61 = vmin.f32 %v8880_v60, 0.0  ;;  %vm5260_vm8 = vcmp.gt.f32.partialorder %v8880_v60, 0.0 }
 0x436   : > { %7230 = vpow2.f32 %v5273_v15  ;;  %v5243_v0 = vmin.f32 %v8882_v3, 0.0  ;;  %v6841_v2 = vpop.f32.mrb[22].mxu1  ;;  %vm5259_vm13 = vcmp.gt.f32.partialorder %v8882_v3, 0.0 }
 0x437   : > { %v5279_v39 = vmul.f32 1.442695, %v5244_v61  ;;  %v8888_v43 = vadd.f32 %v6841_v2, %v5214_v59  ;;  %v5132_v4 = vpop.f32.mrb[23].mxu1  ;;  %v5223_v2 = vld [vmem:[%s8871_s8 + $0x70] sm:$0xff] }
 0x438   : > { %v5277_v7 = vmul.f32 1.442695, %v5243_v0  ;;  %v8890_v8 = vadd.f32 %v5213_v16, %v5132_v4  ;;  %v5224_v16 = vld [vmem:[%s8871_s8 + $0x78] sm:$0xff] }
 0x439   : > { %7232 = vpow2.f32 %v5279_v39  ;;  %v5246_v9 = vmin.f32 %v8888_v43, 0.0  ;;  %vm5262_vm14 = vcmp.gt.f32.partialorder %v8888_v43, 0.0 }
 0x43a   : > { %7234 = vpow2.f32 %v5277_v7  ;;  %v5245_v5 = vmin.f32 %v8890_v8, 0.0  ;;  %v6844_v22 = vpop.f32.mrb[24].mxu1  ;;  %vm5261_vm9 = vcmp.gt.f32.partialorder %v8890_v8, 0.0 }
 0x43b   : > { %v5283_v17 = vmul.f32 1.442695, %v5246_v9  ;;  %v8896_v10 = vadd.f32 %v6844_v22, %v5216_v57  ;;  %v5142_v29 = vpop.f32.mrb[25].mxu1 }
 0x43c   : > { %v5281_v23 = vmul.f32 1.442695, %v5245_v5  ;;  %v8898_v18 = vadd.f32 %v5215_v38, %v5142_v29 }
 0x43d   : > { %7236 = vpow2.f32 %v5283_v17  ;;  %v5248_v41 = vmin.f32 %v8896_v10, 0.0  ;;  %vm5264_vm10 = vcmp.gt.f32.partialorder %v8896_v10, 0.0 }
 0x43e   : > { %7238 = vpow2.f32 %v5281_v23  ;;  %v5247_v26 = vmin.f32 %v8898_v18, 0.0  ;;  %v6847_v27 = vpop.f32.mrb[26].mxu1  ;;  %vm5263_vm15 = vcmp.gt.f32.partialorder %v8898_v18, 0.0 }
 0x43f   : > { %v7229_v28 = vpop.eup %7228  ;;  %v5287_v30 = vmul.f32 1.442695, %v5248_v41  ;;  %v8904_v48 = vadd.f32 %v6847_v27, %v5218_v21  ;;  %v5152_v33 = vpop.f32.mrb[27].mxu1 }
 0x440   : > { %v7231_v6 = vpop.eup %7230  ;;  %v5974_v36 = vadd.f32 -1.0, %v7229_v28  ;;  %v5285_v35 = vmul.f32 1.442695, %v5247_v26  ;;  %v8906_v47 = vadd.f32 %v5217_v53, %v5152_v33 }
 0x441   : > { %v5973_v34 = vadd.f32 -1.0, %v7231_v6  ;;  %7240 = vpow2.f32 %v5287_v30  ;;  %v5250_v44 = vmin.f32 %v8904_v48, 0.0  ;;  %vm5266_vm0 = vcmp.gt.f32.partialorder %v8904_v48, 0.0 }
 0x442   : > { %v5322_v1 = vsel %vm5258_vm3, %v5226_v32, %v5974_v36  ;;  %7242 = vpow2.f32 %v5285_v35  ;;  %v5249_v13 = vmin.f32 %v8906_v47, 0.0  ;;  %v6850_v20 = vpop.f32.mrb[28].mxu1  ;;  %vm5265_vm11 = vcmp.gt.f32.partialorder %v8906_v47, 0.0 }
 0x443   : > { %v7233_v46 = vpop.eup %7232  ;;  %5338 = vst.msk [vmem:[%s7366_s4 + $0x8] sm:$0xff] %vm501_vm4, %v5322_v1  ;;  %v5321_v49 = vsel %vm5257_vm7, %v8875_v45, %v5973_v34  ;;  %v5291_v56 = vmul.f32 1.442695, %v5250_v44  ;;  %v8916_v51 = vadd.f32 %v6850_v20, %v5220_v12  ;;  %v5162_v25 = vpop.f32.mrb[29].mxu1 }
 0x444   : > { %v7235_v24 = vpop.eup %7234  ;;  %5337 = vst.msk [vmem:[%s7366_s4] sm:$0xff] %vm501_vm4, %v5321_v49  ;;  %v5976_v42 = vadd.f32 -1.0, %v7233_v46  ;;  %v5289_v11 = vmul.f32 1.442695, %v5249_v13  ;;  %v8920_v62 = vadd.f32 %v5219_v63, %v5162_v25 }
 0x445   : > { %v5975_v14 = vadd.f32 -1.0, %v7235_v24  ;;  %7244 = vpow2.f32 %v5291_v56  ;;  %v5252_v32 = vmin.f32 %v8916_v51, 0.0  ;;  %vm5268_vm12 = vcmp.gt.f32.partialorder %v8916_v51, 0.0 }
 0x446   : > { %v5324_v45 = vsel %vm5260_vm8, %v8880_v60, %v5976_v42  ;;  %7246 = vpow2.f32 %v5289_v11  ;;  %v5251_v50 = vmin.f32 %v8920_v62, 0.0  ;;  %v6853_v40 = vpop.f32.mrb[30].mxu1  ;;  %vm5267_vm5 = vcmp.gt.f32.partialorder %v8920_v62, 0.0 }
 0x447   : > { %v7237_v54 = vpop.eup %7236  ;;  %5340 = vst.msk [vmem:[%s7366_s4 + $0x18] sm:$0xff] %vm501_vm4, %v5324_v45  ;;  %v5323_v55 = vsel %vm5259_vm13, %v8882_v3, %v5975_v14  ;;  %v5295_v52 = vmul.f32 1.442695, %v5252_v32  ;;  %v8932_v58 = vadd.f32 %v6853_v40, %v5222_v31  ;;  %v5172_v37 = vpop.f32.mrb[31].mxu1 }
 0x448   : > { %v7239_v15 = vpop.eup %7238  ;;  %5339 = vst.msk [vmem:[%s7366_s4 + $0x10] sm:$0xff] %vm501_vm4, %v5323_v55  ;;  %v5978_v60 = vadd.f32 -1.0, %v7237_v54  ;;  %v5293_v59 = vmul.f32 1.442695, %v5251_v50  ;;  %v8936_v61 = vadd.f32 %v5221_v19, %v5172_v37 }
 0x449   : > { %v5977_v0 = vadd.f32 -1.0, %v7239_v15  ;;  %7248 = vpow2.f32 %v5295_v52  ;;  %v5254_v3 = vmin.f32 %v8932_v58, 0.0  ;;  %vm5270_vm1 = vcmp.gt.f32.partialorder %v8932_v58, 0.0 }
 0x44a   : > { %v5326_v39 = vsel %vm5262_vm14, %v8888_v43, %v5978_v60  ;;  %7250 = vpow2.f32 %v5293_v59  ;;  %v5253_v4 = vmin.f32 %v8936_v61, 0.0  ;;  %v6856_v7 = vpop.f32.mrb[32].mxu1  ;;  %vm5269_vm2 = vcmp.gt.f32.partialorder %v8936_v61, 0.0 }
 0x44b   : > { %v7241_v57 = vpop.eup %7240  ;;  %5342 = vst.msk [vmem:[%s7366_s4 + $0x28] sm:$0xff] %vm501_vm4, %v5326_v39  ;;  %v5325_v9 = vsel %vm5261_vm9, %v8890_v8, %v5977_v0  ;;  %v5299_v38 = vmul.f32 1.442695, %v5254_v3  ;;  %v5240_v5 = vadd.f32 %v6856_v7, %v5224_v16  ;;  %v5182_v22 = vpop.f32.mrb[33].mxu1 }
 0x44c   : > { %v7243_v17 = vpop.eup %7242  ;;  %5341 = vst.msk [vmem:[%s7366_s4 + $0x20] sm:$0xff] %vm501_vm4, %v5325_v9  ;;  %v5980_v29 = vadd.f32 -1.0, %v7241_v57  ;;  %v5297_v43 = vmul.f32 1.442695, %v5253_v4  ;;  %v5239_v23 = vadd.f32 %v5223_v2, %v5182_v22 }
 0x44d   : > { %v5979_v21 = vadd.f32 -1.0, %v7243_v17  ;;  %7252 = vpow2.f32 %v5299_v38  ;;  %v5256_v41 = vmin.f32 %v5240_v5, 0.0  ;;  %vm5272_vm6 = vcmp.gt.f32.partialorder %v5240_v5, 0.0 }
 0x44e   : > { %v5328_v53 = vsel %vm5264_vm10, %v8896_v10, %v5980_v29  ;;  %7254 = vpow2.f32 %v5297_v43  ;;  %v5255_v8 = vmin.f32 %v5239_v23, 0.0  ;;  %vm5271_vm3 = vcmp.gt.f32.partialorder %v5239_v23, 0.0 }
 0x44f   : > { %v7245_v26 = vpop.eup %7244  ;;  %5344 = vst.msk [vmem:[%s7366_s4 + $0x38] sm:$0xff] %vm501_vm4, %v5328_v53  ;;  %v5327_v27 = vsel %vm5263_vm15, %v8898_v18, %v5979_v21  ;;  %v5303_v28 = vmul.f32 1.442695, %v5256_v41 }
 0x450   : > { %v7247_v30 = vpop.eup %7246  ;;  %5343 = vst.msk [vmem:[%s7366_s4 + $0x30] sm:$0xff] %vm501_vm4, %v5327_v27  ;;  %v5982_v33 = vadd.f32 -1.0, %v7245_v26  ;;  %v5301_v6 = vmul.f32 1.442695, %v5255_v8 }
 0x451   : > { %v5981_v10 = vadd.f32 -1.0, %v7247_v30  ;;  %7256 = vpow2.f32 %v5303_v28 }
 0x452   : > { %v5330_v36 = vsel %vm5266_vm0, %v8904_v48, %v5982_v33  ;;  %7258 = vpow2.f32 %v5301_v6 }
 0x453   : > { %v7249_v35 = vpop.eup %7248  ;;  %5346 = vst.msk [vmem:[%s7366_s4 + $0x48] sm:$0xff] %vm501_vm4, %v5330_v36  ;;  %v5329_v18 = vsel %vm5265_vm11, %v8906_v47, %v5981_v10 }
 0x454   : > { %v7251_v12 = vpop.eup %7250  ;;  %5345 = vst.msk [vmem:[%s7366_s4 + $0x40] sm:$0xff] %vm501_vm4, %v5329_v18  ;;  %v5984_v34 = vadd.f32 -1.0, %v7249_v35 }
 0x455   : > { %v5983_v44 = vadd.f32 -1.0, %v7251_v12 }
 0x456   : > { %v5332_v63 = vsel %vm5268_vm12, %v8916_v51, %v5984_v34 }
 0x457   : > { %v7253_v48 = vpop.eup %7252  ;;  %5348 = vst.msk [vmem:[%s7366_s4 + $0x58] sm:$0xff] %vm501_vm4, %v5332_v63  ;;  %v5331_v1 = vsel %vm5267_vm5, %v8920_v62, %v5983_v44 }
 0x458   : > { %v7255_v13 = vpop.eup %7254  ;;  %5347 = vst.msk [vmem:[%s7366_s4 + $0x50] sm:$0xff] %vm501_vm4, %v5331_v1  ;;  %v5986_v47 = vadd.f32 -1.0, %v7253_v48 }
 0x459   : > { %v5985_v20 = vadd.f32 -1.0, %v7255_v13 }
 0x45a   : > { %v5334_v46 = vsel %vm5270_vm1, %v8932_v58, %v5986_v47 }
 0x45b   : > { %v7257_v49 = vpop.eup %7256  ;;  %5350 = vst.msk [vmem:[%s7366_s4 + $0x68] sm:$0xff] %vm501_vm4, %v5334_v46  ;;  %v5333_v56 = vsel %vm5269_vm2, %v8936_v61, %v5985_v20 }
 0x45c   : > { %v7259_v51 = vpop.eup %7258  ;;  %5349 = vst.msk [vmem:[%s7366_s4 + $0x60] sm:$0xff] %vm501_vm4, %v5333_v56  ;;  %v5988_v25 = vadd.f32 -1.0, %v7257_v49 }
 0x45d   : > { %v5987_v24 = vadd.f32 -1.0, %v7259_v51 }
 0x45e   : > { %v5336_v42 = vsel %vm5272_vm6, %v5240_v5, %v5988_v25 }
 0x45f   : > { %5352 = vst.msk [vmem:[%s7366_s4 + $0x78] sm:$0xff] %vm501_vm4, %v5336_v42  ;;  %v5335_v11 = vsel %vm5271_vm3, %v5239_v23, %v5987_v24 }
 0x460   : > { %5351 = vst.msk [vmem:[%s7366_s4 + $0x70] sm:$0xff] %vm501_vm4, %v5335_v11 }
 0x461 PF: > { %s13_s16 = sadd.s32 1, %s7298_s16   ;;  %s9025_s12 = smov %s7290_s14 }
 0x462   : > { %p10_p8 = scmp.ge.s32.totalorder %s13_s16, 6   ;;  %s9026_s13 = smov %s7294_s15 }
 0x463   : > { %s9027_s14 = smov %s9030_s17  ;;  %s9028_s15 = smov %s9034_s18 }
 0x464   :  { %12 = sbr.rel (!%p10_p8) target bundleno = 3 (0x3), region = 88 }

</bundles_post_ra>
